<compile_context>
chip_gen: v6e
topology: v6e:2x2x1
jax: 0.10.0
libtpu: 0.0.40
codegen_flags: <defaults>
</compile_context>

<pallas_src>
import jax
import jax.numpy as jnp
from jax.experimental import pallas as pl
from jax.experimental.pallas import tpu as pltpu

# ----------------------------- configuration --------------------------------
BATCH = 2
IN_CHANNELS = 4           # EEG channels
TEMPORAL_LEN = 128        # samples per channel (lane-aligned channel blocks)
K1, K2, K3 = 30, 15, 5    # depthwise conv kernel sizes (fixed by the module)
NUM_CLASSES = 4
BN_EPS = 1e-5
CT = IN_CHANNELS * TEMPORAL_LEN

_VMEM = pl.BlockSpec(memory_space=pltpu.MemorySpace.VMEM)


def _same_pad(k):
    """PyTorch Conv1d(padding='same') asymmetric padding: (left, right)."""
    total = k - 1
    left = total // 2
    return left, total - left


# ------------------------------- kernel --------------------------------------
def _elu(x):
    # exact ELU(alpha=1); min() keeps exp() finite on the untaken branch
    return jnp.where(x > 0, x, jnp.exp(jnp.minimum(x, 0.0)) - 1.0)


def _softmax_rows(x):
    m = jnp.max(x, axis=1, keepdims=True)
    e = jnp.exp(x - m)
    return e / jnp.sum(e, axis=1, keepdims=True)


def srp_gp_fused_kernel(x_ref, bns_ref, bnb_ref,
                        m1_ref, b1_ref, m2_ref, b2_ref, m3_ref, b3_ref,
                        wsum_ref, wmax_ref, wmean_ref, bfc_ref,
                        y_ref):
    """Whole forward pass.

    x_ref: (B, C*T); channel c occupies the lane-aligned slab [:, c*T:(c+1)*T].
    m*_ref[c]: (T, T) Toeplitz matrix of depthwise conv* for channel c.
    b*/bn* rows: (1, C*T) per-channel values repeated T times.
    w{sum,max,mean}_ref: (T, NUM_CLASSES) fc-weight row blocks; bfc_ref: (1, NUM_CLASSES).
    y_ref: (B, NUM_CLASSES) softmax probabilities.
    """
    acc_sum = None
    acc_max = None
    for c in range(IN_CHANNELS):
        lo, hi = c * TEMPORAL_LEN, (c + 1) * TEMPORAL_LEN
        # BatchNorm1d (eval mode, folded to per-channel scale/shift)
        h = x_ref[:, lo:hi] * bns_ref[:, lo:hi] + bnb_ref[:, lo:hi]
        # conv1 / conv2 / conv3 (depthwise, padding='same') + ELU, each one MXU matmul
        h = _elu(jnp.dot(h, m1_ref[c], preferred_element_type=jnp.float32)
                 + b1_ref[:, lo:hi])
        h = _elu(jnp.dot(h, m2_ref[c], preferred_element_type=jnp.float32)
                 + b2_ref[:, lo:hi])
        h = _elu(jnp.dot(h, m3_ref[c], preferred_element_type=jnp.float32)
                 + b3_ref[:, lo:hi])
        # channel pooling (sum / max) accumulated on the fly -> no concat needed
        if c == 0:
            acc_sum, acc_max = h, h
        else:
            acc_sum = acc_sum + h
            acc_max = jnp.maximum(acc_max, h)

    mean_feat = acc_sum * (1.0 / IN_CHANNELS)
    # Linear(3T, 4) with its weight split into the three pooled-feature row blocks
    logits = (jnp.dot(acc_sum, wsum_ref[...], preferred_element_type=jnp.float32)
              + jnp.dot(acc_max, wmax_ref[...], preferred_element_type=jnp.float32)
              + jnp.dot(mean_feat, wmean_ref[...], preferred_element_type=jnp.float32)
              + bfc_ref[...])
    # Dropout(0.5) is identity at inference; Softmax(dim=1)
    y_ref[...] = _softmax_rows(logits)


# ------------------------------- wrapper --------------------------------------
@jax.jit
def srp_forward(x, kp):
    """x: (B, C, T) float32 -> (B, NUM_CLASSES) softmax probabilities."""
    xf = x.reshape(x.shape[0], -1)                      # (B, C*T), contiguous view
    return pl.pallas_call(
        srp_gp_fused_kernel,
        out_shape=jax.ShapeDtypeStruct((x.shape[0], NUM_CLASSES), jnp.float32),
        in_specs=[_VMEM] * 13,
        out_specs=_VMEM,
    )(xf, kp["bn_scale"], kp["bn_shift"],
      kp["m1"], kp["b1"], kp["m2"], kp["b2"], kp["m3"], kp["b3"],
      kp["w_sum"], kp["w_max"], kp["w_mean"], kp["b_fc"])


# ------------------------ parameter preparation -------------------------------
def _toeplitz_same(w, t_len):
    """w: (C, K) depthwise taps -> (C, T, T) matrices M such that x_c @ M[c]
    equals PyTorch Conv1d(groups=C, padding='same') cross-correlation."""
    _, k = w.shape
    left, _ = _same_pad(k)
    t_in = jnp.arange(t_len)[:, None]
    t_out = jnp.arange(t_len)[None, :]
    idx = t_in - t_out + left                        # tap index feeding t_in -> t_out
    valid = (idx >= 0) & (idx < k)
    idx = jnp.clip(idx, 0, k - 1)
    return w[:, idx] * valid[None, :, :].astype(w.dtype)


def prepare_kernel_params(raw):
    """Fold PyTorch-layout parameters into kernel-ready tensors (runs once)."""
    scale = raw["bn_gamma"] / jnp.sqrt(raw["bn_var"] + BN_EPS)
    shift = raw["bn_beta"] - raw["bn_mean"] * scale
    rep = lambda v: jnp.repeat(v, TEMPORAL_LEN)[None, :]       # (1, C*T), channel-major
    w_fc_t = raw["fc_w"].T                                     # (3T, NUM_CLASSES)
    return {
        "bn_scale": rep(scale),
        "bn_shift": rep(shift),
        "m1": _toeplitz_same(raw["conv1_w"][:, 0, :], TEMPORAL_LEN),
        "b1": rep(raw["conv1_b"]),
        "m2": _toeplitz_same(raw["conv2_w"][:, 0, :], TEMPORAL_LEN),
        "b2": rep(raw["conv2_b"]),
        "m3": _toeplitz_same(raw["conv3_w"][:, 0, :], TEMPORAL_LEN),
        "b3": rep(raw["conv3_b"]),
        "w_sum": w_fc_t[0:TEMPORAL_LEN],
        "w_max": w_fc_t[TEMPORAL_LEN:2 * TEMPORAL_LEN],
        "w_mean": w_fc_t[2 * TEMPORAL_LEN:3 * TEMPORAL_LEN],
        "b_fc": raw["fc_b"][None, :],
    }


def init_raw_params(key):
    ks = jax.random.split(key, 10)

    def xavier(k, shape):
        fan = shape[-1]                      # depthwise conv: fan_in == fan_out == K
        lim = (6.0 / (2.0 * fan)) ** 0.5
        return jax.random.uniform(k, shape, jnp.float32, -lim, lim)

    return {
        # BatchNorm1d(in_channels) eval-mode parameters / running statistics
        "bn_gamma": 1.0 + 0.1 * jax.random.normal(ks[0], (IN_CHANNELS,), jnp.float32),
        "bn_beta": 0.1 * jax.random.normal(ks[1], (IN_CHANNELS,), jnp.float32),
        "bn_mean": 0.1 * jax.random.normal(ks[2], (IN_CHANNELS,), jnp.float32),
        "bn_var": 1.0 + 0.2 * jax.random.uniform(ks[3], (IN_CHANNELS,), jnp.float32),
        # depthwise convs, PyTorch weight layout (C_out, C_in/groups = 1, K)
        "conv1_w": xavier(ks[4], (IN_CHANNELS, 1, K1)),
        "conv1_b": 0.01 * jax.random.normal(ks[5], (IN_CHANNELS,), jnp.float32),
        "conv2_w": xavier(ks[6], (IN_CHANNELS, 1, K2)),
        "conv2_b": 0.01 * jax.random.normal(ks[7], (IN_CHANNELS,), jnp.float32),
        "conv3_w": xavier(ks[8], (IN_CHANNELS, 1, K3)),
        "conv3_b": jnp.zeros((IN_CHANNELS,), jnp.float32),
        # classifier fc: Linear(temporal_len * 3, 4)
        "fc_w": 0.05 * jax.random.normal(ks[9], (NUM_CLASSES, 3 * TEMPORAL_LEN), jnp.float32),
        "fc_b": jnp.zeros((NUM_CLASSES,), jnp.float32),
    }


# --------------------------- plain-JAX reference ------------------------------
@jax.jit
def reference_forward(x, raw):
    """XLA reference of the PyTorch forward pass (inference mode) for validation."""
    scale = raw["bn_gamma"] / jnp.sqrt(raw["bn_var"] + BN_EPS)
    shift = raw["bn_beta"] - raw["bn_mean"] * scale
    h = x * scale[None, :, None] + shift[None, :, None]

    def dwconv(v, w, b):
        k = w.shape[-1]
        out = jax.lax.conv_general_dilated(
            v, w, window_strides=(1,), padding=[_same_pad(k)],
            dimension_numbers=("NCH", "OIH", "NCH"),
            feature_group_count=IN_CHANNELS,
            precision=jax.lax.Precision.HIGHEST)
        return out + b[None, :, None]

    h = jax.nn.elu(dwconv(h, raw["conv1_w"], raw["conv1_b"]))
    h = jax.nn.elu(dwconv(h, raw["conv2_w"], raw["conv2_b"]))
    h = jax.nn.elu(dwconv(h, raw["conv3_w"], raw["conv3_b"]))

    s = h.sum(axis=1)
    feat = jnp.concatenate([s, h.max(axis=1), s / IN_CHANNELS], axis=1)   # (B, 3T)
    logits = jnp.dot(feat, raw["fc_w"].T,
                     precision=jax.lax.Precision.HIGHEST) + raw["fc_b"][None, :]
    return jax.nn.softmax(logits, axis=1)


# ----------------------------------- main --------------------------------------
if __name__ == "__main__":
    key = jax.random.PRNGKey(0)
    k_x, k_p = jax.random.split(key)
    x = jax.random.normal(k_x, (BATCH, IN_CHANNELS, TEMPORAL_LEN), jnp.float32)
    raw = init_raw_params(k_p)
    kparams = prepare_kernel_params(raw)

    y = jax.block_until_ready(srp_forward(x, kparams))
    y_ref = jax.block_until_ready(reference_forward(x, raw))

    assert y.shape == (BATCH, NUM_CLASSES)
    assert bool(jnp.all(jnp.isfinite(y)))
    # rows are softmax outputs -> sum to 1
    assert bool(jnp.all(jnp.abs(jnp.sum(y, axis=1) - 1.0) < 1e-4))
    # fused Pallas kernel matches the plain-JAX / XLA reference
    assert bool(jnp.allclose(y, y_ref, atol=5e-3, rtol=5e-3))
    print("KERNEL_OK")
</pallas_src>

<mosaic_0001>
module attributes {stable_mosaic.version = 11 : i64} {
  func.func @srp_gp_fused_kernel(%arg0: memref<2x512xf32, #tpu.memory_space<vmem>>, %arg1: memref<1x512xf32, #tpu.memory_space<vmem>>, %arg2: memref<1x512xf32, #tpu.memory_space<vmem>>, %arg3: memref<4x128x128xf32, #tpu.memory_space<vmem>>, %arg4: memref<1x512xf32, #tpu.memory_space<vmem>>, %arg5: memref<4x128x128xf32, #tpu.memory_space<vmem>>, %arg6: memref<1x512xf32, #tpu.memory_space<vmem>>, %arg7: memref<4x128x128xf32, #tpu.memory_space<vmem>>, %arg8: memref<1x512xf32, #tpu.memory_space<vmem>>, %arg9: memref<128x4xf32, #tpu.memory_space<vmem>>, %arg10: memref<128x4xf32, #tpu.memory_space<vmem>>, %arg11: memref<128x4xf32, #tpu.memory_space<vmem>>, %arg12: memref<1x4xf32, #tpu.memory_space<vmem>>, %arg13: memref<2x4xf32, #tpu.memory_space<vmem>>) attributes {dimension_semantics = [], scalar_prefetch = 0 : i64, scratch_operands = 0 : i64, tpu.core_type = #tpu.core_type<tc>} {
    %c0 = arith.constant 0 : index
    %c0_0 = arith.constant 0 : index
    %0 = vector.load %arg0[%c0, %c0_0] : memref<2x512xf32, #tpu.memory_space<vmem>>, vector<2x128xf32>
    %c0_1 = arith.constant 0 : index
    %c0_2 = arith.constant 0 : index
    %1 = vector.load %arg1[%c0_1, %c0_2] : memref<1x512xf32, #tpu.memory_space<vmem>>, vector<1x128xf32>
    %2 = vector.broadcast %1 : vector<1x128xf32> to vector<2x128xf32>
    %3 = arith.mulf %0, %2 : vector<2x128xf32>
    %c0_3 = arith.constant 0 : index
    %c0_4 = arith.constant 0 : index
    %4 = vector.load %arg2[%c0_3, %c0_4] : memref<1x512xf32, #tpu.memory_space<vmem>>, vector<1x128xf32>
    %5 = vector.broadcast %4 : vector<1x128xf32> to vector<2x128xf32>
    %6 = arith.addf %3, %5 : vector<2x128xf32>
    %c0_5 = arith.constant 0 : index
    %c0_6 = arith.constant 0 : index
    %c0_7 = arith.constant 0 : index
    %7 = vector.load %arg3[%c0_5, %c0_6, %c0_7] : memref<4x128x128xf32, #tpu.memory_space<vmem>>, vector<1x128x128xf32>
    %8 = vector.shape_cast %7 : vector<1x128x128xf32> to vector<128x128xf32>
    %cst = arith.constant dense<0.000000e+00> : vector<2x128xf32>
    %9 = tpu.matmul %6, %8, %cst {dimension_numbers = #tpu.dot_dimension_numbers<[1], [0], [0], [1], [0, 0, 1, 1], [], []>} : vector<2x128xf32>, vector<128x128xf32>, vector<2x128xf32> -> vector<2x128xf32>
    %c0_8 = arith.constant 0 : index
    %c0_9 = arith.constant 0 : index
    %10 = vector.load %arg4[%c0_8, %c0_9] : memref<1x512xf32, #tpu.memory_space<vmem>>, vector<1x128xf32>
    %11 = vector.broadcast %10 : vector<1x128xf32> to vector<2x128xf32>
    %12 = arith.addf %9, %11 : vector<2x128xf32>
    %cst_10 = arith.constant 0.000000e+00 : f32
    %13 = vector.broadcast %cst_10 : f32 to vector<2x128xf32>
    %14 = arith.cmpf ogt, %12, %13 : vector<2x128xf32>
    %cst_11 = arith.constant 0.000000e+00 : f32
    %15 = vector.broadcast %cst_11 : f32 to vector<2x128xf32>
    %16 = arith.minimumf %12, %15 : vector<2x128xf32>
    %17 = math.exp %16 : vector<2x128xf32>
    %cst_12 = arith.constant 1.000000e+00 : f32
    %18 = vector.broadcast %cst_12 : f32 to vector<2x128xf32>
    %19 = arith.subf %17, %18 : vector<2x128xf32>
    %20 = arith.select %14, %12, %19 : vector<2x128xi1>, vector<2x128xf32>
    %c0_13 = arith.constant 0 : index
    %c0_14 = arith.constant 0 : index
    %c0_15 = arith.constant 0 : index
    %21 = vector.load %arg5[%c0_13, %c0_14, %c0_15] : memref<4x128x128xf32, #tpu.memory_space<vmem>>, vector<1x128x128xf32>
    %22 = vector.shape_cast %21 : vector<1x128x128xf32> to vector<128x128xf32>
    %cst_16 = arith.constant dense<0.000000e+00> : vector<2x128xf32>
    %23 = tpu.matmul %20, %22, %cst_16 {dimension_numbers = #tpu.dot_dimension_numbers<[1], [0], [0], [1], [0, 0, 1, 1], [], []>} : vector<2x128xf32>, vector<128x128xf32>, vector<2x128xf32> -> vector<2x128xf32>
    %c0_17 = arith.constant 0 : index
    %c0_18 = arith.constant 0 : index
    %24 = vector.load %arg6[%c0_17, %c0_18] : memref<1x512xf32, #tpu.memory_space<vmem>>, vector<1x128xf32>
    %25 = vector.broadcast %24 : vector<1x128xf32> to vector<2x128xf32>
    %26 = arith.addf %23, %25 : vector<2x128xf32>
    %cst_19 = arith.constant 0.000000e+00 : f32
    %27 = vector.broadcast %cst_19 : f32 to vector<2x128xf32>
    %28 = arith.cmpf ogt, %26, %27 : vector<2x128xf32>
    %cst_20 = arith.constant 0.000000e+00 : f32
    %29 = vector.broadcast %cst_20 : f32 to vector<2x128xf32>
    %30 = arith.minimumf %26, %29 : vector<2x128xf32>
    %31 = math.exp %30 : vector<2x128xf32>
    %cst_21 = arith.constant 1.000000e+00 : f32
    %32 = vector.broadcast %cst_21 : f32 to vector<2x128xf32>
    %33 = arith.subf %31, %32 : vector<2x128xf32>
    %34 = arith.select %28, %26, %33 : vector<2x128xi1>, vector<2x128xf32>
    %c0_22 = arith.constant 0 : index
    %c0_23 = arith.constant 0 : index
    %c0_24 = arith.constant 0 : index
    %35 = vector.load %arg7[%c0_22, %c0_23, %c0_24] : memref<4x128x128xf32, #tpu.memory_space<vmem>>, vector<1x128x128xf32>
    %36 = vector.shape_cast %35 : vector<1x128x128xf32> to vector<128x128xf32>
    %cst_25 = arith.constant dense<0.000000e+00> : vector<2x128xf32>
    %37 = tpu.matmul %34, %36, %cst_25 {dimension_numbers = #tpu.dot_dimension_numbers<[1], [0], [0], [1], [0, 0, 1, 1], [], []>} : vector<2x128xf32>, vector<128x128xf32>, vector<2x128xf32> -> vector<2x128xf32>
    %c0_26 = arith.constant 0 : index
    %c0_27 = arith.constant 0 : index
    %38 = vector.load %arg8[%c0_26, %c0_27] : memref<1x512xf32, #tpu.memory_space<vmem>>, vector<1x128xf32>
    %39 = vector.broadcast %38 : vector<1x128xf32> to vector<2x128xf32>
    %40 = arith.addf %37, %39 : vector<2x128xf32>
    %cst_28 = arith.constant 0.000000e+00 : f32
    %41 = vector.broadcast %cst_28 : f32 to vector<2x128xf32>
    %42 = arith.cmpf ogt, %40, %41 : vector<2x128xf32>
    %cst_29 = arith.constant 0.000000e+00 : f32
    %43 = vector.broadcast %cst_29 : f32 to vector<2x128xf32>
    %44 = arith.minimumf %40, %43 : vector<2x128xf32>
    %45 = math.exp %44 : vector<2x128xf32>
    %cst_30 = arith.constant 1.000000e+00 : f32
    %46 = vector.broadcast %cst_30 : f32 to vector<2x128xf32>
    %47 = arith.subf %45, %46 : vector<2x128xf32>
    %48 = arith.select %42, %40, %47 : vector<2x128xi1>, vector<2x128xf32>
    %c0_31 = arith.constant 0 : index
    %c128 = arith.constant 128 : index
    %49 = vector.load %arg0[%c0_31, %c128] : memref<2x512xf32, #tpu.memory_space<vmem>>, vector<2x128xf32>
    %c0_32 = arith.constant 0 : index
    %c128_33 = arith.constant 128 : index
    %50 = vector.load %arg1[%c0_32, %c128_33] : memref<1x512xf32, #tpu.memory_space<vmem>>, vector<1x128xf32>
    %51 = vector.broadcast %50 : vector<1x128xf32> to vector<2x128xf32>
    %52 = arith.mulf %49, %51 : vector<2x128xf32>
    %c0_34 = arith.constant 0 : index
    %c128_35 = arith.constant 128 : index
    %53 = vector.load %arg2[%c0_34, %c128_35] : memref<1x512xf32, #tpu.memory_space<vmem>>, vector<1x128xf32>
    %54 = vector.broadcast %53 : vector<1x128xf32> to vector<2x128xf32>
    %55 = arith.addf %52, %54 : vector<2x128xf32>
    %c1 = arith.constant 1 : index
    %c0_36 = arith.constant 0 : index
    %c0_37 = arith.constant 0 : index
    %56 = vector.load %arg3[%c1, %c0_36, %c0_37] : memref<4x128x128xf32, #tpu.memory_space<vmem>>, vector<1x128x128xf32>
    %57 = vector.shape_cast %56 : vector<1x128x128xf32> to vector<128x128xf32>
    %cst_38 = arith.constant dense<0.000000e+00> : vector<2x128xf32>
    %58 = tpu.matmul %55, %57, %cst_38 {dimension_numbers = #tpu.dot_dimension_numbers<[1], [0], [0], [1], [0, 0, 1, 1], [], []>} : vector<2x128xf32>, vector<128x128xf32>, vector<2x128xf32> -> vector<2x128xf32>
    %c0_39 = arith.constant 0 : index
    %c128_40 = arith.constant 128 : index
    %59 = vector.load %arg4[%c0_39, %c128_40] : memref<1x512xf32, #tpu.memory_space<vmem>>, vector<1x128xf32>
    %60 = vector.broadcast %59 : vector<1x128xf32> to vector<2x128xf32>
    %61 = arith.addf %58, %60 : vector<2x128xf32>
    %cst_41 = arith.constant 0.000000e+00 : f32
    %62 = vector.broadcast %cst_41 : f32 to vector<2x128xf32>
    %63 = arith.cmpf ogt, %61, %62 : vector<2x128xf32>
    %cst_42 = arith.constant 0.000000e+00 : f32
    %64 = vector.broadcast %cst_42 : f32 to vector<2x128xf32>
    %65 = arith.minimumf %61, %64 : vector<2x128xf32>
    %66 = math.exp %65 : vector<2x128xf32>
    %cst_43 = arith.constant 1.000000e+00 : f32
    %67 = vector.broadcast %cst_43 : f32 to vector<2x128xf32>
    %68 = arith.subf %66, %67 : vector<2x128xf32>
    %69 = arith.select %63, %61, %68 : vector<2x128xi1>, vector<2x128xf32>
    %c1_44 = arith.constant 1 : index
    %c0_45 = arith.constant 0 : index
    %c0_46 = arith.constant 0 : index
    %70 = vector.load %arg5[%c1_44, %c0_45, %c0_46] : memref<4x128x128xf32, #tpu.memory_space<vmem>>, vector<1x128x128xf32>
    %71 = vector.shape_cast %70 : vector<1x128x128xf32> to vector<128x128xf32>
    %cst_47 = arith.constant dense<0.000000e+00> : vector<2x128xf32>
    %72 = tpu.matmul %69, %71, %cst_47 {dimension_numbers = #tpu.dot_dimension_numbers<[1], [0], [0], [1], [0, 0, 1, 1], [], []>} : vector<2x128xf32>, vector<128x128xf32>, vector<2x128xf32> -> vector<2x128xf32>
    %c0_48 = arith.constant 0 : index
    %c128_49 = arith.constant 128 : index
    %73 = vector.load %arg6[%c0_48, %c128_49] : memref<1x512xf32, #tpu.memory_space<vmem>>, vector<1x128xf32>
    %74 = vector.broadcast %73 : vector<1x128xf32> to vector<2x128xf32>
    %75 = arith.addf %72, %74 : vector<2x128xf32>
    %cst_50 = arith.constant 0.000000e+00 : f32
    %76 = vector.broadcast %cst_50 : f32 to vector<2x128xf32>
    %77 = arith.cmpf ogt, %75, %76 : vector<2x128xf32>
    %cst_51 = arith.constant 0.000000e+00 : f32
    %78 = vector.broadcast %cst_51 : f32 to vector<2x128xf32>
    %79 = arith.minimumf %75, %78 : vector<2x128xf32>
    %80 = math.exp %79 : vector<2x128xf32>
    %cst_52 = arith.constant 1.000000e+00 : f32
    %81 = vector.broadcast %cst_52 : f32 to vector<2x128xf32>
    %82 = arith.subf %80, %81 : vector<2x128xf32>
    %83 = arith.select %77, %75, %82 : vector<2x128xi1>, vector<2x128xf32>
    %c1_53 = arith.constant 1 : index
    %c0_54 = arith.constant 0 : index
    %c0_55 = arith.constant 0 : index
    %84 = vector.load %arg7[%c1_53, %c0_54, %c0_55] : memref<4x128x128xf32, #tpu.memory_space<vmem>>, vector<1x128x128xf32>
    %85 = vector.shape_cast %84 : vector<1x128x128xf32> to vector<128x128xf32>
    %cst_56 = arith.constant dense<0.000000e+00> : vector<2x128xf32>
    %86 = tpu.matmul %83, %85, %cst_56 {dimension_numbers = #tpu.dot_dimension_numbers<[1], [0], [0], [1], [0, 0, 1, 1], [], []>} : vector<2x128xf32>, vector<128x128xf32>, vector<2x128xf32> -> vector<2x128xf32>
    %c0_57 = arith.constant 0 : index
    %c128_58 = arith.constant 128 : index
    %87 = vector.load %arg8[%c0_57, %c128_58] : memref<1x512xf32, #tpu.memory_space<vmem>>, vector<1x128xf32>
    %88 = vector.broadcast %87 : vector<1x128xf32> to vector<2x128xf32>
    %89 = arith.addf %86, %88 : vector<2x128xf32>
    %cst_59 = arith.constant 0.000000e+00 : f32
    %90 = vector.broadcast %cst_59 : f32 to vector<2x128xf32>
    %91 = arith.cmpf ogt, %89, %90 : vector<2x128xf32>
    %cst_60 = arith.constant 0.000000e+00 : f32
    %92 = vector.broadcast %cst_60 : f32 to vector<2x128xf32>
    %93 = arith.minimumf %89, %92 : vector<2x128xf32>
    %94 = math.exp %93 : vector<2x128xf32>
    %cst_61 = arith.constant 1.000000e+00 : f32
    %95 = vector.broadcast %cst_61 : f32 to vector<2x128xf32>
    %96 = arith.subf %94, %95 : vector<2x128xf32>
    %97 = arith.select %91, %89, %96 : vector<2x128xi1>, vector<2x128xf32>
    %98 = arith.addf %48, %97 : vector<2x128xf32>
    %99 = arith.maximumf %48, %97 : vector<2x128xf32>
    %c0_62 = arith.constant 0 : index
    %c256 = arith.constant 256 : index
    %100 = vector.load %arg0[%c0_62, %c256] : memref<2x512xf32, #tpu.memory_space<vmem>>, vector<2x128xf32>
    %c0_63 = arith.constant 0 : index
    %c256_64 = arith.constant 256 : index
    %101 = vector.load %arg1[%c0_63, %c256_64] : memref<1x512xf32, #tpu.memory_space<vmem>>, vector<1x128xf32>
    %102 = vector.broadcast %101 : vector<1x128xf32> to vector<2x128xf32>
    %103 = arith.mulf %100, %102 : vector<2x128xf32>
    %c0_65 = arith.constant 0 : index
    %c256_66 = arith.constant 256 : index
    %104 = vector.load %arg2[%c0_65, %c256_66] : memref<1x512xf32, #tpu.memory_space<vmem>>, vector<1x128xf32>
    %105 = vector.broadcast %104 : vector<1x128xf32> to vector<2x128xf32>
    %106 = arith.addf %103, %105 : vector<2x128xf32>
    %c2 = arith.constant 2 : index
    %c0_67 = arith.constant 0 : index
    %c0_68 = arith.constant 0 : index
    %107 = vector.load %arg3[%c2, %c0_67, %c0_68] : memref<4x128x128xf32, #tpu.memory_space<vmem>>, vector<1x128x128xf32>
    %108 = vector.shape_cast %107 : vector<1x128x128xf32> to vector<128x128xf32>
    %cst_69 = arith.constant dense<0.000000e+00> : vector<2x128xf32>
    %109 = tpu.matmul %106, %108, %cst_69 {dimension_numbers = #tpu.dot_dimension_numbers<[1], [0], [0], [1], [0, 0, 1, 1], [], []>} : vector<2x128xf32>, vector<128x128xf32>, vector<2x128xf32> -> vector<2x128xf32>
    %c0_70 = arith.constant 0 : index
    %c256_71 = arith.constant 256 : index
    %110 = vector.load %arg4[%c0_70, %c256_71] : memref<1x512xf32, #tpu.memory_space<vmem>>, vector<1x128xf32>
    %111 = vector.broadcast %110 : vector<1x128xf32> to vector<2x128xf32>
    %112 = arith.addf %109, %111 : vector<2x128xf32>
    %cst_72 = arith.constant 0.000000e+00 : f32
    %113 = vector.broadcast %cst_72 : f32 to vector<2x128xf32>
    %114 = arith.cmpf ogt, %112, %113 : vector<2x128xf32>
    %cst_73 = arith.constant 0.000000e+00 : f32
    %115 = vector.broadcast %cst_73 : f32 to vector<2x128xf32>
    %116 = arith.minimumf %112, %115 : vector<2x128xf32>
    %117 = math.exp %116 : vector<2x128xf32>
    %cst_74 = arith.constant 1.000000e+00 : f32
    %118 = vector.broadcast %cst_74 : f32 to vector<2x128xf32>
    %119 = arith.subf %117, %118 : vector<2x128xf32>
    %120 = arith.select %114, %112, %119 : vector<2x128xi1>, vector<2x128xf32>
    %c2_75 = arith.constant 2 : index
    %c0_76 = arith.constant 0 : index
    %c0_77 = arith.constant 0 : index
    %121 = vector.load %arg5[%c2_75, %c0_76, %c0_77] : memref<4x128x128xf32, #tpu.memory_space<vmem>>, vector<1x128x128xf32>
    %122 = vector.shape_cast %121 : vector<1x128x128xf32> to vector<128x128xf32>
    %cst_78 = arith.constant dense<0.000000e+00> : vector<2x128xf32>
    %123 = tpu.matmul %120, %122, %cst_78 {dimension_numbers = #tpu.dot_dimension_numbers<[1], [0], [0], [1], [0, 0, 1, 1], [], []>} : vector<2x128xf32>, vector<128x128xf32>, vector<2x128xf32> -> vector<2x128xf32>
    %c0_79 = arith.constant 0 : index
    %c256_80 = arith.constant 256 : index
    %124 = vector.load %arg6[%c0_79, %c256_80] : memref<1x512xf32, #tpu.memory_space<vmem>>, vector<1x128xf32>
    %125 = vector.broadcast %124 : vector<1x128xf32> to vector<2x128xf32>
    %126 = arith.addf %123, %125 : vector<2x128xf32>
    %cst_81 = arith.constant 0.000000e+00 : f32
    %127 = vector.broadcast %cst_81 : f32 to vector<2x128xf32>
    %128 = arith.cmpf ogt, %126, %127 : vector<2x128xf32>
    %cst_82 = arith.constant 0.000000e+00 : f32
    %129 = vector.broadcast %cst_82 : f32 to vector<2x128xf32>
    %130 = arith.minimumf %126, %129 : vector<2x128xf32>
    %131 = math.exp %130 : vector<2x128xf32>
    %cst_83 = arith.constant 1.000000e+00 : f32
    %132 = vector.broadcast %cst_83 : f32 to vector<2x128xf32>
    %133 = arith.subf %131, %132 : vector<2x128xf32>
    %134 = arith.select %128, %126, %133 : vector<2x128xi1>, vector<2x128xf32>
    %c2_84 = arith.constant 2 : index
    %c0_85 = arith.constant 0 : index
    %c0_86 = arith.constant 0 : index
    %135 = vector.load %arg7[%c2_84, %c0_85, %c0_86] : memref<4x128x128xf32, #tpu.memory_space<vmem>>, vector<1x128x128xf32>
    %136 = vector.shape_cast %135 : vector<1x128x128xf32> to vector<128x128xf32>
    %cst_87 = arith.constant dense<0.000000e+00> : vector<2x128xf32>
    %137 = tpu.matmul %134, %136, %cst_87 {dimension_numbers = #tpu.dot_dimension_numbers<[1], [0], [0], [1], [0, 0, 1, 1], [], []>} : vector<2x128xf32>, vector<128x128xf32>, vector<2x128xf32> -> vector<2x128xf32>
    %c0_88 = arith.constant 0 : index
    %c256_89 = arith.constant 256 : index
    %138 = vector.load %arg8[%c0_88, %c256_89] : memref<1x512xf32, #tpu.memory_space<vmem>>, vector<1x128xf32>
    %139 = vector.broadcast %138 : vector<1x128xf32> to vector<2x128xf32>
    %140 = arith.addf %137, %139 : vector<2x128xf32>
    %cst_90 = arith.constant 0.000000e+00 : f32
    %141 = vector.broadcast %cst_90 : f32 to vector<2x128xf32>
    %142 = arith.cmpf ogt, %140, %141 : vector<2x128xf32>
    %cst_91 = arith.constant 0.000000e+00 : f32
    %143 = vector.broadcast %cst_91 : f32 to vector<2x128xf32>
    %144 = arith.minimumf %140, %143 : vector<2x128xf32>
    %145 = math.exp %144 : vector<2x128xf32>
    %cst_92 = arith.constant 1.000000e+00 : f32
    %146 = vector.broadcast %cst_92 : f32 to vector<2x128xf32>
    %147 = arith.subf %145, %146 : vector<2x128xf32>
    %148 = arith.select %142, %140, %147 : vector<2x128xi1>, vector<2x128xf32>
    %149 = arith.addf %98, %148 : vector<2x128xf32>
    %150 = arith.maximumf %99, %148 : vector<2x128xf32>
    %c0_93 = arith.constant 0 : index
    %c384 = arith.constant 384 : index
    %151 = vector.load %arg0[%c0_93, %c384] : memref<2x512xf32, #tpu.memory_space<vmem>>, vector<2x128xf32>
    %c0_94 = arith.constant 0 : index
    %c384_95 = arith.constant 384 : index
    %152 = vector.load %arg1[%c0_94, %c384_95] : memref<1x512xf32, #tpu.memory_space<vmem>>, vector<1x128xf32>
    %153 = vector.broadcast %152 : vector<1x128xf32> to vector<2x128xf32>
    %154 = arith.mulf %151, %153 : vector<2x128xf32>
    %c0_96 = arith.constant 0 : index
    %c384_97 = arith.constant 384 : index
    %155 = vector.load %arg2[%c0_96, %c384_97] : memref<1x512xf32, #tpu.memory_space<vmem>>, vector<1x128xf32>
    %156 = vector.broadcast %155 : vector<1x128xf32> to vector<2x128xf32>
    %157 = arith.addf %154, %156 : vector<2x128xf32>
    %c3 = arith.constant 3 : index
    %c0_98 = arith.constant 0 : index
    %c0_99 = arith.constant 0 : index
    %158 = vector.load %arg3[%c3, %c0_98, %c0_99] : memref<4x128x128xf32, #tpu.memory_space<vmem>>, vector<1x128x128xf32>
    %159 = vector.shape_cast %158 : vector<1x128x128xf32> to vector<128x128xf32>
    %cst_100 = arith.constant dense<0.000000e+00> : vector<2x128xf32>
    %160 = tpu.matmul %157, %159, %cst_100 {dimension_numbers = #tpu.dot_dimension_numbers<[1], [0], [0], [1], [0, 0, 1, 1], [], []>} : vector<2x128xf32>, vector<128x128xf32>, vector<2x128xf32> -> vector<2x128xf32>
    %c0_101 = arith.constant 0 : index
    %c384_102 = arith.constant 384 : index
    %161 = vector.load %arg4[%c0_101, %c384_102] : memref<1x512xf32, #tpu.memory_space<vmem>>, vector<1x128xf32>
    %162 = vector.broadcast %161 : vector<1x128xf32> to vector<2x128xf32>
    %163 = arith.addf %160, %162 : vector<2x128xf32>
    %cst_103 = arith.constant 0.000000e+00 : f32
    %164 = vector.broadcast %cst_103 : f32 to vector<2x128xf32>
    %165 = arith.cmpf ogt, %163, %164 : vector<2x128xf32>
    %cst_104 = arith.constant 0.000000e+00 : f32
    %166 = vector.broadcast %cst_104 : f32 to vector<2x128xf32>
    %167 = arith.minimumf %163, %166 : vector<2x128xf32>
    %168 = math.exp %167 : vector<2x128xf32>
    %cst_105 = arith.constant 1.000000e+00 : f32
    %169 = vector.broadcast %cst_105 : f32 to vector<2x128xf32>
    %170 = arith.subf %168, %169 : vector<2x128xf32>
    %171 = arith.select %165, %163, %170 : vector<2x128xi1>, vector<2x128xf32>
    %c3_106 = arith.constant 3 : index
    %c0_107 = arith.constant 0 : index
    %c0_108 = arith.constant 0 : index
    %172 = vector.load %arg5[%c3_106, %c0_107, %c0_108] : memref<4x128x128xf32, #tpu.memory_space<vmem>>, vector<1x128x128xf32>
    %173 = vector.shape_cast %172 : vector<1x128x128xf32> to vector<128x128xf32>
    %cst_109 = arith.constant dense<0.000000e+00> : vector<2x128xf32>
    %174 = tpu.matmul %171, %173, %cst_109 {dimension_numbers = #tpu.dot_dimension_numbers<[1], [0], [0], [1], [0, 0, 1, 1], [], []>} : vector<2x128xf32>, vector<128x128xf32>, vector<2x128xf32> -> vector<2x128xf32>
    %c0_110 = arith.constant 0 : index
    %c384_111 = arith.constant 384 : index
    %175 = vector.load %arg6[%c0_110, %c384_111] : memref<1x512xf32, #tpu.memory_space<vmem>>, vector<1x128xf32>
    %176 = vector.broadcast %175 : vector<1x128xf32> to vector<2x128xf32>
    %177 = arith.addf %174, %176 : vector<2x128xf32>
    %cst_112 = arith.constant 0.000000e+00 : f32
    %178 = vector.broadcast %cst_112 : f32 to vector<2x128xf32>
    %179 = arith.cmpf ogt, %177, %178 : vector<2x128xf32>
    %cst_113 = arith.constant 0.000000e+00 : f32
    %180 = vector.broadcast %cst_113 : f32 to vector<2x128xf32>
    %181 = arith.minimumf %177, %180 : vector<2x128xf32>
    %182 = math.exp %181 : vector<2x128xf32>
    %cst_114 = arith.constant 1.000000e+00 : f32
    %183 = vector.broadcast %cst_114 : f32 to vector<2x128xf32>
    %184 = arith.subf %182, %183 : vector<2x128xf32>
    %185 = arith.select %179, %177, %184 : vector<2x128xi1>, vector<2x128xf32>
    %c3_115 = arith.constant 3 : index
    %c0_116 = arith.constant 0 : index
    %c0_117 = arith.constant 0 : index
    %186 = vector.load %arg7[%c3_115, %c0_116, %c0_117] : memref<4x128x128xf32, #tpu.memory_space<vmem>>, vector<1x128x128xf32>
    %187 = vector.shape_cast %186 : vector<1x128x128xf32> to vector<128x128xf32>
    %cst_118 = arith.constant dense<0.000000e+00> : vector<2x128xf32>
    %188 = tpu.matmul %185, %187, %cst_118 {dimension_numbers = #tpu.dot_dimension_numbers<[1], [0], [0], [1], [0, 0, 1, 1], [], []>} : vector<2x128xf32>, vector<128x128xf32>, vector<2x128xf32> -> vector<2x128xf32>
    %c0_119 = arith.constant 0 : index
    %c384_120 = arith.constant 384 : index
    %189 = vector.load %arg8[%c0_119, %c384_120] : memref<1x512xf32, #tpu.memory_space<vmem>>, vector<1x128xf32>
    %190 = vector.broadcast %189 : vector<1x128xf32> to vector<2x128xf32>
    %191 = arith.addf %188, %190 : vector<2x128xf32>
    %cst_121 = arith.constant 0.000000e+00 : f32
    %192 = vector.broadcast %cst_121 : f32 to vector<2x128xf32>
    %193 = arith.cmpf ogt, %191, %192 : vector<2x128xf32>
    %cst_122 = arith.constant 0.000000e+00 : f32
    %194 = vector.broadcast %cst_122 : f32 to vector<2x128xf32>
    %195 = arith.minimumf %191, %194 : vector<2x128xf32>
    %196 = math.exp %195 : vector<2x128xf32>
    %cst_123 = arith.constant 1.000000e+00 : f32
    %197 = vector.broadcast %cst_123 : f32 to vector<2x128xf32>
    %198 = arith.subf %196, %197 : vector<2x128xf32>
    %199 = arith.select %193, %191, %198 : vector<2x128xi1>, vector<2x128xf32>
    %200 = arith.addf %149, %199 : vector<2x128xf32>
    %201 = arith.maximumf %150, %199 : vector<2x128xf32>
    %cst_124 = arith.constant 2.500000e-01 : f32
    %202 = vector.broadcast %cst_124 : f32 to vector<2x128xf32>
    %203 = arith.mulf %200, %202 : vector<2x128xf32>
    %c0_125 = arith.constant 0 : index
    %c0_126 = arith.constant 0 : index
    %204 = vector.load %arg9[%c0_125, %c0_126] : memref<128x4xf32, #tpu.memory_space<vmem>>, vector<128x4xf32>
    %cst_127 = arith.constant dense<0.000000e+00> : vector<2x4xf32>
    %205 = tpu.matmul %200, %204, %cst_127 {dimension_numbers = #tpu.dot_dimension_numbers<[1], [0], [0], [1], [0, 0, 1, 1], [], []>} : vector<2x128xf32>, vector<128x4xf32>, vector<2x4xf32> -> vector<2x4xf32>
    %c0_128 = arith.constant 0 : index
    %c0_129 = arith.constant 0 : index
    %206 = vector.load %arg10[%c0_128, %c0_129] : memref<128x4xf32, #tpu.memory_space<vmem>>, vector<128x4xf32>
    %cst_130 = arith.constant dense<0.000000e+00> : vector<2x4xf32>
    %207 = tpu.matmul %201, %206, %cst_130 {dimension_numbers = #tpu.dot_dimension_numbers<[1], [0], [0], [1], [0, 0, 1, 1], [], []>} : vector<2x128xf32>, vector<128x4xf32>, vector<2x4xf32> -> vector<2x4xf32>
    %208 = arith.addf %205, %207 : vector<2x4xf32>
    %c0_131 = arith.constant 0 : index
    %c0_132 = arith.constant 0 : index
    %209 = vector.load %arg11[%c0_131, %c0_132] : memref<128x4xf32, #tpu.memory_space<vmem>>, vector<128x4xf32>
    %cst_133 = arith.constant dense<0.000000e+00> : vector<2x4xf32>
    %210 = tpu.matmul %203, %209, %cst_133 {dimension_numbers = #tpu.dot_dimension_numbers<[1], [0], [0], [1], [0, 0, 1, 1], [], []>} : vector<2x128xf32>, vector<128x4xf32>, vector<2x4xf32> -> vector<2x4xf32>
    %211 = arith.addf %208, %210 : vector<2x4xf32>
    %c0_134 = arith.constant 0 : index
    %c0_135 = arith.constant 0 : index
    %212 = vector.load %arg12[%c0_134, %c0_135] : memref<1x4xf32, #tpu.memory_space<vmem>>, vector<1x4xf32>
    %213 = vector.broadcast %212 : vector<1x4xf32> to vector<2x4xf32>
    %214 = arith.addf %211, %213 : vector<2x4xf32>
    %cst_136 = arith.constant dense<0xFF800000> : vector<2xf32>
    %215 = vector.multi_reduction <maximumf>, %214, %cst_136 [1] : vector<2x4xf32> to vector<2xf32>
    %216 = vector.shape_cast %215 : vector<2xf32> to vector<2x1xf32>
    %217 = vector.broadcast %216 : vector<2x1xf32> to vector<2x4xf32>
    %218 = arith.subf %214, %217 : vector<2x4xf32>
    %219 = math.exp %218 : vector<2x4xf32>
    %cst_137 = arith.constant dense<0.000000e+00> : vector<2xf32>
    %220 = vector.multi_reduction <add>, %219, %cst_137 [1] : vector<2x4xf32> to vector<2xf32>
    %221 = vector.shape_cast %220 : vector<2xf32> to vector<2x1xf32>
    %222 = vector.broadcast %221 : vector<2x1xf32> to vector<2x4xf32>
    %223 = arith.divf %219, %222 : vector<2x4xf32>
    %c0_138 = arith.constant 0 : index
    %c0_139 = arith.constant 0 : index
    %224 = vector.load %arg13[%c0_138, %c0_139] : memref<2x4xf32, #tpu.memory_space<vmem>>, vector<2x4xf32>
    tpu.vector_store %arg13[%c0_138, %c0_139], %223 {strides = array<i32>} : memref<2x4xf32, #tpu.memory_space<vmem>>, vector<2x4xf32>,
    return
  }
}

</mosaic_0001>

<bundles_post_ra>
// kernel: srp_forward.1
= control target key start
LH: loop header
LB: loop body
LE: loop exit
PB: predicated region body
PF: predicated region fallthrough
CT: control target
= control target key end

     0   :  { %18 = vsyncpa [#allocation3], 0  ;;  %s3194_s0 = inlined_call_operand.vmem [shape: f32[2,512], index: 0, kind: input, shape index: {}]   ;;  %s3195_s1 = inlined_call_operand.vmem [shape: f32[1,512], index: 1, kind: input, shape index: {}]   ;;  %s3196_s2 = inlined_call_operand.vmem [shape: f32[1,512], index: 2, kind: input, shape index: {}]   ;;  %s3197_s3 = inlined_call_operand.hbm [shape: f32[4,128,128], index: 3, kind: input, shape index: {}]   ;;  %s3198_s4 = inlined_call_operand.vmem [shape: f32[1,512], index: 4, kind: input, shape index: {}]   ;;  %s3199_s5 = inlined_call_operand.hbm [shape: f32[4,128,128], index: 5, kind: input, shape index: {}]   ;;  %s3200_s6 = inlined_call_operand.vmem [shape: f32[1,512], index: 6, kind: input, shape index: {}]   ;;  %s3201_s7 = inlined_call_operand.hbm [shape: f32[4,128,128], index: 7, kind: input, shape index: {}]   ;;  %s3202_s8 = inlined_call_operand.vmem [shape: f32[1,512], index: 8, kind: input, shape index: {}]   ;;  %s3203_s9 = inlined_call_operand.vmem [shape: f32[128,4], index: 9, kind: input, shape index: {}]   ;;  %s3204_s10 = inlined_call_operand.vmem [shape: f32[128,4], index: 10, kind: input, shape index: {}]   ;;  %s3205_s11 = inlined_call_operand.vmem [shape: f32[128,4], index: 11, kind: input, shape index: {}]   ;;  %s3206_s12 = inlined_call_operand.vmem [shape: f32[1,4], index: 12, kind: input, shape index: {}]   ;;  %s3207_s13 = inlined_call_operand.hbm [shape: f32[2,4], index: 13, kind: output, shape index: {}]  }
   0x1   :  { %19 = vsyncpa [#allocation6], 0 }
   0x2   :  { %20 = vsyncpa [#allocation4], 0  ;;  %s2589_s25 = smov [#allocation5]   ;;  %s2590_s27 = smov [#allocation2]  }
   0x3   :  { %s46_s26 = sshll.u32 %s2589_s25, 4  ;;  %s32_s28 = sshll.u32 %s2590_s27, 4  ;;  %s47_s26 = int_to_ptr.vmem [resolvable:$true] %s46_s26  ;;  %s33_s28 = int_to_ptr.vmem [resolvable:$true] %s32_s28 }
   0x4   :  { %s2511_s29 = scalar_lea.vmem %s47_s26, 8192  ;;  %p2516_p1 = scmp.lt.s32.totalorder %s47_s26, %s47_s26 }
   0x5   :  { %p2512_p0 = scmp.ne.s32.totalorder %s47_s26, %s2511_s29  ;;  %p2517_p2 = scmp.lt.s32.totalorder %s2511_s29, %s2511_s29 }
   0x7   :  { %p2518_p3 = por %p2517_p2, %p2516_p1 }
   0x9   :  { %p2519_p4 = pnand %p2518_p3, %p2512_p0 }
   0xb   :  { %2522 = shalt.err (!%p2519_p4)
}
   0xc   :  { %s2591_s30 = smov 128   ;;  %s2592_s14 = smov 8  }
   0xd   :  { %52 = dma.hbm_to_vmem [thread:$0]  %s3199_s5, 8192, %s47_s26, [#allocation6], %s2591_s30, %s2591_s30, %s2592_s14  }
   0xe   :  { %s2531_s17 = scalar_lea.vmem %s33_s28, 8192  ;;  %p2536_p6 = scmp.lt.s32.totalorder %s33_s28, %s33_s28 }
   0xf   :  { %p2532_p5 = scmp.ne.s32.totalorder %s33_s28, %s2531_s17  ;;  %p2537_p7 = scmp.lt.s32.totalorder %s2531_s17, %s2531_s17 }
  0x11   :  { %p2538_p8 = por %p2537_p7, %p2536_p6 }
  0x13   :  { %p2539_p9 = pnand %p2538_p8, %p2532_p5 }
  0x15   :  { %2542 = shalt.err (!%p2539_p9)
}
  0x16   :  { %38 = dma.hbm_to_vmem [thread:$0]  %s3197_s3, 8192, %s33_s28, [#allocation3], %s2591_s30, %s2591_s30, %s2592_s14  }
  0x17   :  { %s2593_s20 = smov [#allocation7]  }
  0x18   :  { %s60_s21 = sshll.u32 %s2593_s20, 4  ;;  %s61_s21 = int_to_ptr.vmem [resolvable:$true] %s60_s21 }
  0x19   :  { %s2551_s22 = scalar_lea.vmem %s61_s21, 8192  ;;  %p2556_p11 = scmp.lt.s32.totalorder %s61_s21, %s61_s21 }
  0x1a   :  { %p2552_p10 = scmp.ne.s32.totalorder %s61_s21, %s2551_s22  ;;  %p2557_p12 = scmp.lt.s32.totalorder %s2551_s22, %s2551_s22 }
  0x1c   :  { %p2558_p13 = por %p2557_p12, %p2556_p11 }
  0x1e   :  { %p2559_p0 = pnand %p2558_p13, %p2552_p10 }
  0x20   :  { %2562 = shalt.err (!%p2559_p0)
}
  0x21   :  { %66 = dma.hbm_to_vmem [thread:$0]  %s3201_s7, 8192, %s61_s21, [#allocation6], %s2591_s30, %s2591_s30, %s2592_s14  }
  0x22   :  { %2583 = dma.done.wait [#allocation3], 8192  }
  0x23   :  { %2584 = vsyncadd [#allocation3], 4294959104 }
  0x24   :  { %2585 = dma.done.wait [#allocation6], 16384  }
  0x25   :  { %2586 = vsyncadd [#allocation6], 4294950912  ;;  %v2594_v0 = vmov 0.0   ;;  %vm2595_vm0 = vmmov 0   ;;  %v118_v1 = vld [vmem:[#allocation2 + $0x78] sm:$0xff]  ;;  %v117_v2 = vld [vmem:[#allocation2 + $0x70] sm:$0xff] }
  0x26   :  { %1942 = vmatprep.subr.mxu0 %v2594_v0  ;;  %1974 = vmatprep.mubr.msk.f32.mxu0 %vm2595_vm0, %v2594_v0  ;;  %v116_v3 = vld [vmem:[#allocation2 + $0x68] sm:$0xff]  ;;  %v115_v4 = vld [vmem:[#allocation2 + $0x60] sm:$0xff]  ;;  %v114_v5 = vld [vmem:[#allocation2 + $0x58] sm:$0xff]  ;;  %vm1625_vm13 = vcmask 25600  }
  0x27   :  { %1977 = vmatprep.subr.mxu1 %v2594_v0  ;;  %2009 = vmatprep.mubr.msk.f32.mxu1 %vm2595_vm0, %v2594_v0  ;;  %v217_v6 = vld [vmem:[#allocation5 + $0x78] sm:$0xff]  ;;  %v216_v7 = vld [vmem:[#allocation5 + $0x70] sm:$0xff]  ;;  %v215_v9 = vld [vmem:[#allocation5 + $0x68] sm:$0xff] }
  0x28   :  { %1943 = vmatpush3.msra.mxu0 %v118_v1  ;;  %1978 = vmatpush3.msra.mxu1 %v217_v6  ;;  %v113_v8 = vld [vmem:[#allocation2 + $0x50] sm:$0xff]  ;;  %v112_v10 = vld [vmem:[#allocation2 + $0x48] sm:$0xff]  ;;  %v214_v11 = vld [vmem:[#allocation5 + $0x60] sm:$0xff] }
  0x29   :  { %1944 = vmatprep.subr.mxu0 %v2594_v0  ;;  %1979 = vmatprep.subr.mxu1 %v2594_v0  ;;  %v111_v12 = vld [vmem:[#allocation2 + $0x40] sm:$0xff]  ;;  %v110_v13 = vld [vmem:[#allocation2 + $0x38] sm:$0xff]  ;;  %v109_v14 = vld [vmem:[#allocation2 + $0x30] sm:$0xff] }
  0x2a   :  { %1945 = vmatpush3.msra.mxu0 %v117_v2  ;;  %1980 = vmatpush3.msra.mxu1 %v216_v7  ;;  %v108_v15 = vld [vmem:[#allocation2 + $0x28] sm:$0xff]  ;;  %v107_v16 = vld [vmem:[#allocation2 + $0x20] sm:$0xff]  ;;  %v106_v19 = vld [vmem:[#allocation2 + $0x18] sm:$0xff] }
  0x2b   :  { %1946 = vmatprep.subr.mxu0 %v2594_v0  ;;  %1981 = vmatprep.subr.mxu1 %v2594_v0  ;;  %v86_v17 = vld [vmem:[%s3194_s0] sm:$0x3]  ;;  %v105_v20 = vld [vmem:[#allocation2 + $0x10] sm:$0xff]  ;;  %v104_v23 = vld [vmem:[#allocation2 + $0x8] sm:$0xff] }
  0x2c   :  { %1947 = vmatpush3.msra.mxu0 %v116_v3  ;;  %1982 = vmatpush3.msra.mxu1 %v215_v9  ;;  %v1654_v18 = vld [vmem:[%s3195_s1] ss:$0 sm:$0xff]  ;;  %v213_v26 = vld [vmem:[#allocation5 + $0x58] sm:$0xff]  ;;  %v212_v27 = vld [vmem:[#allocation5 + $0x50] sm:$0xff] }
  0x2d   :  { %1948 = vmatprep.subr.mxu0 %v2594_v0  ;;  %1983 = vmatprep.subr.mxu1 %v2594_v0  ;;  %v94_v21 = vmul.f32 %v1654_v18, %v86_v17  ;;  %v1655_v22 = vld [vmem:[%s3196_s2] ss:$0 sm:$0xff]  ;;  %v211_v28 = vld [vmem:[#allocation5 + $0x48] sm:$0xff]  ;;  %v209_v30 = vld [vmem:[#allocation5 + $0x38] sm:$0xff] }
  0x2e   :  { %1949 = vmatpush3.msra.mxu0 %v115_v4  ;;  %1984 = vmatpush3.msra.mxu1 %v214_v11  ;;  %v103_v24 = vld [vmem:[#allocation2] sm:$0xff]  ;;  %v208_v31 = vld [vmem:[#allocation5 + $0x30] sm:$0xff]  ;;  %v207_v32 = vld [vmem:[#allocation5 + $0x28] sm:$0xff] }
  0x2f   :  { %1950 = vmatprep.subr.mxu0 %v2594_v0  ;;  %1985 = vmatprep.subr.mxu1 %v2594_v0  ;;  %v102_v25 = vadd.f32 %v1655_v22, %v94_v21  ;;  %v210_v29 = vld [vmem:[#allocation5 + $0x40] sm:$0xff]  ;;  %v205_v34 = vld [vmem:[#allocation5 + $0x18] sm:$0xff]  ;;  %v204_v35 = vld [vmem:[#allocation5 + $0x10] sm:$0xff] }
  0x30   :  { %1951 = vmatpush3.msra.mxu0 %v114_v5  ;;  %1986 = vmatpush3.msra.mxu1 %v213_v26  ;;  %v206_v33 = vld [vmem:[#allocation5 + $0x20] sm:$0xff]  ;;  %v203_v36 = vld [vmem:[#allocation5 + $0x8] sm:$0xff]  ;;  %v316_v38 = vld [vmem:[#allocation7 + $0x78] sm:$0xff] }
  0x31   :  { %1952 = vmatprep.subr.mxu0 %v2594_v0  ;;  %1987 = vmatprep.subr.mxu1 %v2594_v0  ;;  %v202_v37 = vld [vmem:[#allocation5] sm:$0xff]  ;;  %v315_v39 = vld [vmem:[#allocation7 + $0x70] sm:$0xff]  ;;  %v314_v40 = vld [vmem:[#allocation7 + $0x68] sm:$0xff] }
  0x32   :  { %1953 = vmatpush3.msra.mxu0 %v113_v8  ;;  %1988 = vmatpush3.msra.mxu1 %v212_v27  ;;  %v313_v41 = vld [vmem:[#allocation7 + $0x60] sm:$0xff]  ;;  %v433_v50 = vld [vmem:[#allocation2 + $0xf8] sm:$0xff]  ;;  %v432_v52 = vld [vmem:[#allocation2 + $0xf0] sm:$0xff] }
  0x33   :  { %1954 = vmatprep.subr.mxu0 %v2594_v0  ;;  %1989 = vmatprep.subr.mxu1 %v2594_v0  ;;  %v1656_v42 = vld [vmem:[%s3198_s4] ss:$0 sm:$0xff]  ;;  %v431_v53 = vld [vmem:[#allocation2 + $0xe8] sm:$0xff]  ;;  %v429_v55 = vld [vmem:[#allocation2 + $0xd8] sm:$0xff] }
  0x34   :  { %1955 = vmatpush3.msra.mxu0 %v112_v10  ;;  %1990 = vmatpush3.msra.mxu1 %v211_v28  ;;  %v430_v54 = vld [vmem:[#allocation2 + $0xe0] sm:$0xff]  ;;  %v428_v56 = vld [vmem:[#allocation2 + $0xd0] sm:$0xff]  ;;  %v427_v57 = vld [vmem:[#allocation2 + $0xc8] sm:$0xff] }
  0x35   :  { %1956 = vmatprep.subr.mxu0 %v2594_v0  ;;  %1991 = vmatprep.subr.mxu1 %v2594_v0  ;;  %v426_v58 = vld [vmem:[#allocation2 + $0xc0] sm:$0xff]  ;;  %v425_v59 = vld [vmem:[#allocation2 + $0xb8] sm:$0xff]  ;;  %v424_v60 = vld [vmem:[#allocation2 + $0xb0] sm:$0xff] }
  0x36   :  { %1957 = vmatpush3.msra.mxu0 %v111_v12  ;;  %1992 = vmatpush3.msra.mxu1 %v210_v29  ;;  %v423_v61 = vld [vmem:[#allocation2 + $0xa8] sm:$0xff]  ;;  %v422_v62 = vld [vmem:[#allocation2 + $0xa0] sm:$0xff]  ;;  %v421_v2 = vld [vmem:[#allocation2 + $0x98] sm:$0xff] }
  0x37   :  { %1958 = vmatprep.subr.mxu0 %v2594_v0  ;;  %1993 = vmatprep.subr.mxu1 %v2594_v0  ;;  %v400_v63 = vld [vmem:[%s3194_s0 + $0x2] sm:$0x3]  ;;  %v1662_v1 = vld [vmem:[%s3195_s1 + $0x1] ss:$0 sm:$0xff]  ;;  %v420_v3 = vld [vmem:[#allocation2 + $0x90] sm:$0xff] }
  0x38   :  { %1959 = vmatpush3.msra.mxu0 %v110_v13  ;;  %1994 = vmatpush3.msra.mxu1 %v209_v30  ;;  %v408_v4 = vmul.f32 %v1662_v1, %v400_v63  ;;  %v1663_v5 = vld [vmem:[%s3196_s2 + $0x1] ss:$0 sm:$0xff]  ;;  %v419_v6 = vld [vmem:[#allocation2 + $0x88] sm:$0xff]  ;;  %v312_v9 = vld [vmem:[#allocation7 + $0x58] sm:$0xff] }
  0x39   :  { %1960 = vmatprep.subr.mxu0 %v2594_v0  ;;  %1995 = vmatprep.subr.mxu1 %v2594_v0  ;;  %v418_v7 = vld [vmem:[#allocation2 + $0x80] sm:$0xff]  ;;  %v311_v10 = vld [vmem:[#allocation7 + $0x50] sm:$0xff]  ;;  %v310_v11 = vld [vmem:[#allocation7 + $0x48] sm:$0xff] }
  0x3a   :  { %1961 = vmatpush3.msra.mxu0 %v109_v14  ;;  %1996 = vmatpush3.msra.mxu1 %v208_v31  ;;  %v416_v8 = vadd.f32 %v1663_v5, %v408_v4  ;;  %v309_v12 = vld [vmem:[#allocation7 + $0x40] sm:$0xff]  ;;  %v308_v13 = vld [vmem:[#allocation7 + $0x38] sm:$0xff]  ;;  %v307_v14 = vld [vmem:[#allocation7 + $0x30] sm:$0xff] }
  0x3b   :  { %1962 = vmatprep.subr.mxu0 %v2594_v0  ;;  %1997 = vmatprep.subr.mxu1 %v2594_v0  ;;  %v304_v17 = vld [vmem:[#allocation7 + $0x18] sm:$0xff]  ;;  %v303_v18 = vld [vmem:[#allocation7 + $0x10] sm:$0xff]  ;;  %v1658_v21 = vld [vmem:[%s3200_s6] ss:$0 sm:$0xff] }
  0x3c   :  { %1963 = vmatpush3.msra.mxu0 %v108_v15  ;;  %1998 = vmatpush3.msra.mxu1 %v207_v32  ;;  %v306_v15 = vld [vmem:[#allocation7 + $0x28] sm:$0xff]  ;;  %v533_v29 = vld [vmem:[#allocation5 + $0xf8] sm:$0xff]  ;;  %v532_v31 = vld [vmem:[#allocation5 + $0xf0] sm:$0xff] }
  0x3d   :  { %1964 = vmatprep.subr.mxu0 %v2594_v0  ;;  %1999 = vmatprep.subr.mxu1 %v2594_v0  ;;  %v531_v32 = vld [vmem:[#allocation5 + $0xe8] sm:$0xff]  ;;  %v744_v63 = vld [vmem:[#allocation2 + $0x138] sm:$0xff]  ;;  %v743_v1 = vld [vmem:[#allocation2 + $0x130] sm:$0xff] }
  0x3e   :  { %1965 = vmatpush3.msra.mxu0 %v107_v16  ;;  %2000 = vmatpush3.msra.mxu1 %v206_v33  ;;  %v305_v16 = vld [vmem:[#allocation7 + $0x20] sm:$0xff] }
  0x3f   :  { %1966 = vmatprep.subr.mxu0 %v2594_v0  ;;  %2001 = vmatprep.subr.mxu1 %v2594_v0  ;;  %v530_v33 = vld [vmem:[#allocation5 + $0xe0] sm:$0xff] }
  0x40   :  { %1967 = vmatpush3.msra.mxu0 %v106_v19  ;;  %2002 = vmatpush3.msra.mxu1 %v205_v34  ;;  %v302_v19 = vld [vmem:[#allocation7 + $0x8] sm:$0xff]  ;;  %v1664_v34 = vld [vmem:[%s3198_s4 + $0x1] ss:$0 sm:$0xff]  ;;  %v719_v4 = vld [vmem:[%s3194_s0 + $0x4] sm:$0x3] }
  0x41   :  { %1968 = vmatprep.subr.mxu0 %v2594_v0  ;;  %2003 = vmatprep.subr.mxu1 %v2594_v0  ;;  %v1670_v5 = vld [vmem:[%s3195_s1 + $0x2] ss:$0 sm:$0xff] }
  0x42   :  { %1969 = vmatpush3.msra.mxu0 %v105_v20  ;;  %2004 = vmatpush3.msra.mxu1 %v204_v35  ;;  %v301_v20 = vld [vmem:[#allocation7] sm:$0xff]  ;;  %v529_v35 = vld [vmem:[#allocation5 + $0xd8] sm:$0xff] }
  0x43   :  { %1970 = vmatprep.subr.mxu0 %v2594_v0  ;;  %2005 = vmatprep.subr.mxu1 %v2594_v0 }
  0x44   :  { %1971 = vmatpush3.msra.mxu0 %v104_v23  ;;  %2006 = vmatpush3.msra.mxu1 %v203_v36 }
  0x45   :  { %1972 = vmatprep.subr.mxu0 %v2594_v0  ;;  %2007 = vmatprep.subr.mxu1 %v2594_v0 }
  0x46   :  { %1973 = vmatpush3.msra.mxu0 %v103_v24  ;;  %2008 = vmatpush3.msra.mxu1 %v202_v37  ;;  %v528_v37 = vld [vmem:[#allocation5 + $0xd0] sm:$0xff] }
  0x47   :  { %1975 = vmatmul.mubr.f32.vlgmr.msra.gmra.mxu0 %v102_v25  ;;  %2012 = vmatprep.subr.mxu0 %v2594_v0 }
  0x48   :  { %2044 = vmatprep.mubr.msk.f32.mxu0 %vm2595_vm0, %v2594_v0  ;;  %2047 = vmatprep.subr.mxu1 %v2594_v0 }
  0x49   :  { %2013 = vmatpush3.msra.mxu0 %v316_v38 }
  0x4a   :  { %2014 = vmatprep.subr.mxu0 %v2594_v0 }
  0x4b   :  { %2015 = vmatpush3.msra.mxu0 %v315_v39 }
  0x4c   :  { %2016 = vmatprep.subr.mxu0 %v2594_v0 }
  0x4d   :  { %2017 = vmatpush3.msra.mxu0 %v314_v40  ;;  %v527_v40 = vld [vmem:[#allocation5 + $0xc8] sm:$0xff] }
  0x4e   :  { %2018 = vmatprep.subr.mxu0 %v2594_v0 }
  0x4f   :  { %2019 = vmatpush3.msra.mxu0 %v313_v41 }
  0x50   :  { %2020 = vmatprep.subr.mxu0 %v2594_v0 }
  0x51   :  { %2021 = vmatpush3.msra.mxu0 %v312_v9  ;;  %v1671_v9 = vld [vmem:[%s3196_s2 + $0x2] ss:$0 sm:$0xff] }
  0x52   :  { %2022 = vmatprep.subr.mxu0 %v2594_v0 }
  0x53   :  { %2023 = vmatpush3.msra.mxu0 %v311_v10  ;;  %v738_v10 = vld [vmem:[#allocation2 + $0x108] sm:$0xff] }
  0x54   :  { %2024 = vmatprep.subr.mxu0 %v2594_v0 }
  0x55   :  { %2025 = vmatpush3.msra.mxu0 %v310_v11  ;;  %v737_v11 = vld [vmem:[#allocation2 + $0x100] sm:$0xff] }
  0x56   :  { %2026 = vmatprep.subr.mxu0 %v2594_v0 }
  0x57   :  { %2027 = vmatpush3.msra.mxu0 %v309_v12 }
  0x58   :  { %2028 = vmatprep.subr.mxu0 %v2594_v0 }
  0x59   :  { %2029 = vmatpush3.msra.mxu0 %v308_v13  ;;  %v633_v13 = vld [vmem:[#allocation7 + $0xf8] sm:$0xff] }
  0x5a   :  { %2030 = vmatprep.subr.mxu0 %v2594_v0 }
  0x5b   :  { %2031 = vmatpush3.msra.mxu0 %v307_v14  ;;  %v632_v14 = vld [vmem:[#allocation7 + $0xf0] sm:$0xff] }
  0x5c   :  { %2032 = vmatprep.subr.mxu0 %v2594_v0 }
  0x5d   :  { %2033 = vmatpush3.msra.mxu0 %v306_v15  ;;  %v631_v15 = vld [vmem:[#allocation7 + $0xe8] sm:$0xff] }
  0x5e   :  { %2034 = vmatprep.subr.mxu0 %v2594_v0 }
  0x5f   :  { %2035 = vmatpush3.msra.mxu0 %v305_v16  ;;  %v630_v16 = vld [vmem:[#allocation7 + $0xe0] sm:$0xff] }
  0x60   :  { %2036 = vmatprep.subr.mxu0 %v2594_v0 }
  0x61   :  { %2037 = vmatpush3.msra.mxu0 %v304_v17  ;;  %v629_v17 = vld [vmem:[#allocation7 + $0xd8] sm:$0xff] }
  0x62   :  { %2038 = vmatprep.subr.mxu0 %v2594_v0 }
  0x63   :  { %2039 = vmatpush3.msra.mxu0 %v303_v18  ;;  %v628_v18 = vld [vmem:[#allocation7 + $0xd0] sm:$0xff] }
  0x64   :  { %2040 = vmatprep.subr.mxu0 %v2594_v0 }
  0x65   :  { %2041 = vmatpush3.msra.mxu0 %v302_v19  ;;  %v627_v19 = vld [vmem:[#allocation7 + $0xc8] sm:$0xff] }
  0x66   :  { %2042 = vmatprep.subr.mxu0 %v2594_v0 }
  0x67   :  { %2043 = vmatpush3.msra.mxu0 %v301_v20  ;;  %v626_v20 = vld [vmem:[#allocation7 + $0xc0] sm:$0xff] }
  0x68   :  { %2082 = vmatprep.subr.mxu0 %v2594_v0 }
 0x107   :  { %v192_v43 = vpop.f32.mrf.mxu0 }
 0x108   :  { %v193_v44 = vadd.f32 %v1656_v42, %v192_v43  ;;  %v526_v42 = vld [vmem:[#allocation5 + $0xc0] sm:$0xff] }
 0x109   :  { %v1976_v45 = vpop.f32.mrf.mxu0 }
 0x10a   :  { %v197_v46 = vmin.f32 %v193_v44, 0.0  ;;  %vm196_vm1 = vcmp.gt.f32.partialorder %v193_v44, 0.0  ;;  %v524_v45 = vld [vmem:[#allocation5 + $0xb0] sm:$0xff] }
 0x10c   :  { %v198_v47 = vmul.f32 1.442695, %v197_v46  ;;  %v523_v46 = vld [vmem:[#allocation5 + $0xa8] sm:$0xff] }
 0x10e   :  { %2475 = vpow2.f32 %v198_v47  ;;  %v522_v47 = vld [vmem:[#allocation5 + $0xa0] sm:$0xff] }
 0x11b   :  { %v2476_v48 = vpop.eup %2475 }
 0x11c   :  { %v1657_v49 = vadd.f32 -1.0, %v2476_v48  ;;  %v521_v48 = vld [vmem:[#allocation5 + $0x98] sm:$0xff] }
 0x11e   :  { %v201_v51 = vsel %vm196_vm1, %v193_v44, %v1657_v49  ;;  %v525_v44 = vld [vmem:[#allocation5 + $0xb8] sm:$0xff]  ;;  %v520_v49 = vld [vmem:[#allocation5 + $0x90] sm:$0xff] }
 0x11f   :  { %2010 = vmatmul.mubr.f32.vlgmr.msra.gmra.mxu1 %v201_v51 }
 0x120   :  { %2048 = vmatpush3.msra.mxu1 %v433_v50  ;;  %2079 = vmatprep.mubr.msk.f32.mxu1 %vm2595_vm0, %v2594_v0  ;;  %v519_v50 = vld [vmem:[#allocation5 + $0x88] sm:$0xff] }
 0x121   :  { %2049 = vmatprep.subr.mxu1 %v2594_v0 }
 0x122   :  { %2050 = vmatpush3.msra.mxu1 %v432_v52  ;;  %v518_v52 = vld [vmem:[#allocation5 + $0x80] sm:$0xff] }
 0x123   :  { %2051 = vmatprep.subr.mxu1 %v2594_v0 }
 0x124   :  { %2052 = vmatpush3.msra.mxu1 %v431_v53 }
 0x125   :  { %2053 = vmatprep.subr.mxu1 %v2594_v0 }
 0x126   :  { %2054 = vmatpush3.msra.mxu1 %v430_v54  ;;  %v752_v54 = vld [vmem:[#allocation2 + $0x178] sm:$0xff] }
 0x127   :  { %2055 = vmatprep.subr.mxu1 %v2594_v0 }
 0x128   :  { %2056 = vmatpush3.msra.mxu1 %v429_v55 }
 0x129   :  { %2057 = vmatprep.subr.mxu1 %v2594_v0 }
 0x12a   :  { %2058 = vmatpush3.msra.mxu1 %v428_v56  ;;  %v751_v56 = vld [vmem:[#allocation2 + $0x170] sm:$0xff] }
 0x12b   :  { %2059 = vmatprep.subr.mxu1 %v2594_v0 }
 0x12c   :  { %2060 = vmatpush3.msra.mxu1 %v427_v57  ;;  %v750_v57 = vld [vmem:[#allocation2 + $0x168] sm:$0xff] }
 0x12d   :  { %2061 = vmatprep.subr.mxu1 %v2594_v0 }
 0x12e   :  { %2062 = vmatpush3.msra.mxu1 %v426_v58  ;;  %v749_v58 = vld [vmem:[#allocation2 + $0x160] sm:$0xff] }
 0x12f   :  { %2063 = vmatprep.subr.mxu1 %v2594_v0 }
 0x130   :  { %2064 = vmatpush3.msra.mxu1 %v425_v59  ;;  %v748_v59 = vld [vmem:[#allocation2 + $0x158] sm:$0xff] }
 0x131   :  { %2065 = vmatprep.subr.mxu1 %v2594_v0 }
 0x132   :  { %2066 = vmatpush3.msra.mxu1 %v424_v60  ;;  %v747_v60 = vld [vmem:[#allocation2 + $0x150] sm:$0xff] }
 0x133   :  { %2067 = vmatprep.subr.mxu1 %v2594_v0 }
 0x134   :  { %2068 = vmatpush3.msra.mxu1 %v423_v61  ;;  %v746_v61 = vld [vmem:[#allocation2 + $0x148] sm:$0xff] }
 0x135   :  { %2069 = vmatprep.subr.mxu1 %v2594_v0 }
 0x136   :  { %2070 = vmatpush3.msra.mxu1 %v422_v62  ;;  %v745_v62 = vld [vmem:[#allocation2 + $0x140] sm:$0xff] }
 0x137   :  { %2071 = vmatprep.subr.mxu1 %v2594_v0 }
 0x138   :  { %2072 = vmatpush3.msra.mxu1 %v421_v2  ;;  %v742_v2 = vld [vmem:[#allocation2 + $0x128] sm:$0xff] }
 0x139   :  { %2073 = vmatprep.subr.mxu1 %v2594_v0 }
 0x13a   :  { %2074 = vmatpush3.msra.mxu1 %v420_v3  ;;  %v741_v3 = vld [vmem:[#allocation2 + $0x120] sm:$0xff] }
 0x13b   :  { %2075 = vmatprep.subr.mxu1 %v2594_v0 }
 0x13c   :  { %2076 = vmatpush3.msra.mxu1 %v419_v6  ;;  %v740_v6 = vld [vmem:[#allocation2 + $0x118] sm:$0xff] }
 0x13d   :  { %2077 = vmatprep.subr.mxu1 %v2594_v0 }
 0x13e   :  { %2078 = vmatpush3.msra.mxu1 %v418_v7  ;;  %v739_v7 = vld [vmem:[#allocation2 + $0x110] sm:$0xff] }
 0x13f   :  { %2080 = vmatmul.mubr.f32.vlgmr.msra.gmra.mxu1 %v416_v8  ;;  %2117 = vmatprep.subr.mxu1 %v2594_v0  ;;  %v727_v8 = vmul.f32 %v1670_v5, %v719_v4  ;;  %v1069_v4 = vld [vmem:[#allocation2 + $0x1e8] sm:$0xff]  ;;  %v1068_v5 = vld [vmem:[#allocation2 + $0x1e0] sm:$0xff] }
 0x140   :  { %2149 = vmatprep.mubr.msk.f32.mxu1 %vm2595_vm0, %v2594_v0  ;;  %2118 = vmatpush3.msra.mxu1 %v633_v13  ;;  %v1060_v13 = vld [vmem:[#allocation2 + $0x1a0] sm:$0xff] }
 0x141   :  { %v735_v12 = vadd.f32 %v1671_v9, %v727_v8  ;;  %2119 = vmatprep.subr.mxu1 %v2594_v0  ;;  %v1065_v8 = vld [vmem:[#allocation2 + $0x1c8] sm:$0xff]  ;;  %v1064_v9 = vld [vmem:[#allocation2 + $0x1c0] sm:$0xff] }
 0x142   :  { %2120 = vmatpush3.msra.mxu1 %v632_v14  ;;  %v1038_v14 = vld [vmem:[%s3194_s0 + $0x6] sm:$0x3] }
 0x143   :  { %2121 = vmatprep.subr.mxu1 %v2594_v0 }
 0x144   :  { %2122 = vmatpush3.msra.mxu1 %v631_v15  ;;  %v1678_v15 = vld [vmem:[%s3195_s1 + $0x3] ss:$0 sm:$0xff] }
 0x145   :  { %2123 = vmatprep.subr.mxu1 %v2594_v0 }
 0x146   :  { %2124 = vmatpush3.msra.mxu1 %v630_v16  ;;  %v1059_v16 = vld [vmem:[#allocation2 + $0x198] sm:$0xff] }
 0x147   :  { %2125 = vmatprep.subr.mxu1 %v2594_v0 }
 0x148   :  { %2126 = vmatpush3.msra.mxu1 %v629_v17  ;;  %v1058_v17 = vld [vmem:[#allocation2 + $0x190] sm:$0xff] }
 0x149   :  { %2127 = vmatprep.subr.mxu1 %v2594_v0 }
 0x14a   :  { %2128 = vmatpush3.msra.mxu1 %v628_v18  ;;  %v1046_v18 = vmul.f32 %v1678_v15, %v1038_v14  ;;  %v1164_v15 = vld [vmem:[#allocation5 + $0x1c0] sm:$0xff] }
 0x14b   :  { %2129 = vmatprep.subr.mxu1 %v2594_v0 }
 0x14c   :  { %2130 = vmatpush3.msra.mxu1 %v627_v19  ;;  %v1679_v19 = vld [vmem:[%s3196_s2 + $0x3] ss:$0 sm:$0xff] }
 0x14d   :  { %2131 = vmatprep.subr.mxu1 %v2594_v0 }
 0x14e   :  { %2132 = vmatpush3.msra.mxu1 %v626_v20  ;;  %v1057_v20 = vld [vmem:[#allocation2 + $0x188] sm:$0xff] }
 0x14f   :  { %2133 = vmatprep.subr.mxu1 %v2594_v0 }
 0x1df   :  { %v291_v22 = vpop.f32.mrf.mxu1 }
 0x1e0   :  { %v292_v23 = vadd.f32 %v1658_v21, %v291_v22  ;;  %v625_v21 = vld [vmem:[#allocation7 + $0xb8] sm:$0xff]  ;;  %v624_v22 = vld [vmem:[#allocation7 + $0xb0] sm:$0xff] }
 0x1e1   :  { %v2011_v24 = vpop.f32.mrf.mxu1  ;;  %2134 = vmatpush3.msra.mxu1 %v625_v21  ;;  %v1056_v21 = vld [vmem:[#allocation2 + $0x180] sm:$0xff] }
 0x1e2   :  { %v296_v25 = vmin.f32 %v292_v23, 0.0  ;;  %vm295_vm2 = vcmp.gt.f32.partialorder %v292_v23, 0.0  ;;  %2135 = vmatprep.subr.mxu1 %v2594_v0  ;;  %v622_v24 = vld [vmem:[#allocation7 + $0xa0] sm:$0xff] }
 0x1e3   :  { %2136 = vmatpush3.msra.mxu1 %v624_v22  ;;  %v1054_v22 = vadd.f32 %v1679_v19, %v1046_v18  ;;  %v1162_v18 = vld [vmem:[#allocation5 + $0x1b0] sm:$0xff]  ;;  %v1161_v19 = vld [vmem:[#allocation5 + $0x1a8] sm:$0xff] }
 0x1e4   :  { %v297_v26 = vmul.f32 1.442695, %v296_v25  ;;  %2137 = vmatprep.subr.mxu1 %v2594_v0  ;;  %v621_v25 = vld [vmem:[#allocation7 + $0x98] sm:$0xff] }
 0x1e6   :  { %2477 = vpow2.f32 %v297_v26  ;;  %v620_v26 = vld [vmem:[#allocation7 + $0x90] sm:$0xff] }
 0x1f3   :  { %v2478_v27 = vpop.eup %2477 }
 0x1f4   :  { %v1659_v28 = vadd.f32 -1.0, %v2478_v27  ;;  %v619_v27 = vld [vmem:[#allocation7 + $0x88] sm:$0xff] }
 0x1f6   :  { %v300_v30 = vsel %vm295_vm2, %v292_v23, %v1659_v28  ;;  %v623_v23 = vld [vmem:[#allocation7 + $0xa8] sm:$0xff]  ;;  %v618_v28 = vld [vmem:[#allocation7 + $0x80] sm:$0xff] }
 0x1f7   :  { %2045 = vmatmul.mubr.f32.vlgmr.msra.gmra.mxu0 %v300_v30  ;;  %2138 = vmatpush3.msra.mxu1 %v623_v23  ;;  %v952_v23 = vld [vmem:[#allocation7 + $0x178] sm:$0xff] }
 0x1f8   :  { %2083 = vmatpush3.msra.mxu0 %v533_v29  ;;  %2114 = vmatprep.mubr.msk.f32.mxu0 %vm2595_vm0, %v2594_v0 }
 0x1f9   :  { %2084 = vmatprep.subr.mxu0 %v2594_v0  ;;  %2139 = vmatprep.subr.mxu1 %v2594_v0 }
 0x1fa   :  { %2085 = vmatpush3.msra.mxu0 %v532_v31  ;;  %2140 = vmatpush3.msra.mxu1 %v622_v24  ;;  %v1666_v31 = vld [vmem:[%s3200_s6 + $0x1] ss:$0 sm:$0xff]  ;;  %v951_v24 = vld [vmem:[#allocation7 + $0x170] sm:$0xff] }
 0x1fb   :  { %2086 = vmatprep.subr.mxu0 %v2594_v0  ;;  %2141 = vmatprep.subr.mxu1 %v2594_v0 }
 0x1fc   :  { %2087 = vmatpush3.msra.mxu0 %v531_v32  ;;  %2142 = vmatpush3.msra.mxu1 %v621_v25  ;;  %v950_v25 = vld [vmem:[#allocation7 + $0x168] sm:$0xff] }
 0x1fd   :  { %2088 = vmatprep.subr.mxu0 %v2594_v0  ;;  %2143 = vmatprep.subr.mxu1 %v2594_v0 }
 0x1fe   :  { %2089 = vmatpush3.msra.mxu0 %v530_v33  ;;  %2144 = vmatpush3.msra.mxu1 %v620_v26  ;;  %v949_v26 = vld [vmem:[#allocation7 + $0x160] sm:$0xff] }
 0x1ff   :  { %v507_v36 = vpop.f32.mrf.mxu1  ;;  %2090 = vmatprep.subr.mxu0 %v2594_v0  ;;  %2145 = vmatprep.subr.mxu1 %v2594_v0 }
 0x200   :  { %v508_v38 = vadd.f32 %v1664_v34, %v507_v36  ;;  %2091 = vmatpush3.msra.mxu0 %v529_v35  ;;  %2146 = vmatpush3.msra.mxu1 %v619_v27  ;;  %v948_v27 = vld [vmem:[#allocation7 + $0x158] sm:$0xff] }
 0x201   :  { %v2081_v39 = vpop.f32.mrf.mxu1  ;;  %2092 = vmatprep.subr.mxu0 %v2594_v0  ;;  %2147 = vmatprep.subr.mxu1 %v2594_v0 }
 0x202   :  { %v512_v41 = vmin.f32 %v508_v38, 0.0  ;;  %2093 = vmatpush3.msra.mxu0 %v528_v37  ;;  %vm511_vm3 = vcmp.gt.f32.partialorder %v508_v38, 0.0  ;;  %2148 = vmatpush3.msra.mxu1 %v618_v28  ;;  %v852_v39 = vld [vmem:[#allocation5 + $0x178] sm:$0xff]  ;;  %v947_v28 = vld [vmem:[#allocation7 + $0x150] sm:$0xff] }
 0x203   :  { %2094 = vmatprep.subr.mxu0 %v2594_v0  ;;  %2187 = vmatprep.subr.mxu1 %v2594_v0 }
 0x204   :  { %v513_v43 = vmul.f32 1.442695, %v512_v41  ;;  %2095 = vmatpush3.msra.mxu0 %v527_v40  ;;  %v851_v41 = vld [vmem:[#allocation5 + $0x170] sm:$0xff] }
 0x205   :  { %2096 = vmatprep.subr.mxu0 %v2594_v0 }
 0x206   :  { %2479 = vpow2.f32 %v513_v43  ;;  %2097 = vmatpush3.msra.mxu0 %v526_v42  ;;  %v850_v42 = vld [vmem:[#allocation5 + $0x168] sm:$0xff]  ;;  %v849_v43 = vld [vmem:[#allocation5 + $0x160] sm:$0xff] }
 0x207   :  { %2098 = vmatprep.subr.mxu0 %v2594_v0 }
 0x208   :  { %2099 = vmatpush3.msra.mxu0 %v525_v44  ;;  %v1672_v44 = vld [vmem:[%s3198_s4 + $0x2] ss:$0 sm:$0xff] }
 0x209   :  { %2100 = vmatprep.subr.mxu0 %v2594_v0 }
 0x20a   :  { %2101 = vmatpush3.msra.mxu0 %v524_v45  ;;  %v848_v45 = vld [vmem:[#allocation5 + $0x158] sm:$0xff] }
 0x20b   :  { %2102 = vmatprep.subr.mxu0 %v2594_v0 }
 0x20c   :  { %2103 = vmatpush3.msra.mxu0 %v523_v46 }
 0x20d   :  { %2104 = vmatprep.subr.mxu0 %v2594_v0 }
 0x20e   :  { %2105 = vmatpush3.msra.mxu0 %v522_v47  ;;  %v847_v47 = vld [vmem:[#allocation5 + $0x150] sm:$0xff] }
 0x20f   :  { %2106 = vmatprep.subr.mxu0 %v2594_v0 }
 0x210   :  { %2107 = vmatpush3.msra.mxu0 %v521_v48 }
 0x211   :  { %2108 = vmatprep.subr.mxu0 %v2594_v0 }
 0x212   :  { %2109 = vmatpush3.msra.mxu0 %v520_v49 }
 0x213   :  { %v2480_v51 = vpop.eup %2479  ;;  %2110 = vmatprep.subr.mxu0 %v2594_v0 }
 0x214   :  { %2111 = vmatpush3.msra.mxu0 %v519_v50  ;;  %v1665_v53 = vadd.f32 -1.0, %v2480_v51  ;;  %v846_v50 = vld [vmem:[#allocation5 + $0x148] sm:$0xff] }
 0x215   :  { %2112 = vmatprep.subr.mxu0 %v2594_v0 }
 0x216   :  { %2113 = vmatpush3.msra.mxu0 %v518_v52  ;;  %v516_v55 = vsel %vm511_vm3, %v508_v38, %v1665_v53  ;;  %v845_v52 = vld [vmem:[#allocation5 + $0x140] sm:$0xff] }
 0x217   :  { %2115 = vmatmul.mubr.f32.vlgmr.msra.gmra.mxu0 %v516_v55  ;;  %2152 = vmatprep.subr.mxu0 %v2594_v0  ;;  %v843_v55 = vld [vmem:[#allocation5 + $0x130] sm:$0xff] }
 0x218   :  { %2153 = vmatpush3.msra.mxu0 %v752_v54  ;;  %2184 = vmatprep.mubr.msk.f32.mxu0 %vm2595_vm0, %v2594_v0  ;;  %v844_v54 = vld [vmem:[#allocation5 + $0x138] sm:$0xff] }
 0x219   :  { %2154 = vmatprep.subr.mxu0 %v2594_v0 }
 0x21a   :  { %2155 = vmatpush3.msra.mxu0 %v751_v56  ;;  %v842_v56 = vld [vmem:[#allocation5 + $0x128] sm:$0xff] }
 0x21b   :  { %2156 = vmatprep.subr.mxu0 %v2594_v0 }
 0x21c   :  { %2157 = vmatpush3.msra.mxu0 %v750_v57  ;;  %v841_v57 = vld [vmem:[#allocation5 + $0x120] sm:$0xff] }
 0x21d   :  { %2158 = vmatprep.subr.mxu0 %v2594_v0 }
 0x21e   :  { %2159 = vmatpush3.msra.mxu0 %v749_v58  ;;  %v840_v58 = vld [vmem:[#allocation5 + $0x118] sm:$0xff] }
 0x21f   :  { %2160 = vmatprep.subr.mxu0 %v2594_v0 }
 0x220   :  { %2161 = vmatpush3.msra.mxu0 %v748_v59  ;;  %v839_v59 = vld [vmem:[#allocation5 + $0x110] sm:$0xff] }
 0x221   :  { %2162 = vmatprep.subr.mxu0 %v2594_v0 }
 0x222   :  { %2163 = vmatpush3.msra.mxu0 %v747_v60  ;;  %v838_v60 = vld [vmem:[#allocation5 + $0x108] sm:$0xff] }
 0x223   :  { %2164 = vmatprep.subr.mxu0 %v2594_v0 }
 0x224   :  { %2165 = vmatpush3.msra.mxu0 %v746_v61 }
 0x225   :  { %2166 = vmatprep.subr.mxu0 %v2594_v0 }
 0x226   :  { %2167 = vmatpush3.msra.mxu0 %v745_v62  ;;  %v837_v62 = vld [vmem:[#allocation5 + $0x100] sm:$0xff] }
 0x227   :  { %2168 = vmatprep.subr.mxu0 %v2594_v0 }
 0x228   :  { %2169 = vmatpush3.msra.mxu0 %v744_v63 }
 0x229   :  { %2170 = vmatprep.subr.mxu0 %v2594_v0 }
 0x22a   :  { %2171 = vmatpush3.msra.mxu0 %v743_v1  ;;  %v1071_v1 = vld [vmem:[#allocation2 + $0x1f8] sm:$0xff] }
 0x22b   :  { %2172 = vmatprep.subr.mxu0 %v2594_v0 }
 0x22c   :  { %2173 = vmatpush3.msra.mxu0 %v742_v2 }
 0x22d   :  { %2174 = vmatprep.subr.mxu0 %v2594_v0 }
 0x22e   :  { %2175 = vmatpush3.msra.mxu0 %v741_v3  ;;  %v1070_v3 = vld [vmem:[#allocation2 + $0x1f0] sm:$0xff] }
 0x22f   :  { %2176 = vmatprep.subr.mxu0 %v2594_v0 }
 0x230   :  { %2177 = vmatpush3.msra.mxu0 %v740_v6  ;;  %v1067_v6 = vld [vmem:[#allocation2 + $0x1d8] sm:$0xff] }
 0x231   :  { %2178 = vmatprep.subr.mxu0 %v2594_v0 }
 0x232   :  { %2179 = vmatpush3.msra.mxu0 %v739_v7  ;;  %v1066_v7 = vld [vmem:[#allocation2 + $0x1d0] sm:$0xff] }
 0x233   :  { %2180 = vmatprep.subr.mxu0 %v2594_v0 }
 0x234   :  { %2181 = vmatpush3.msra.mxu0 %v738_v10  ;;  %v1063_v10 = vld [vmem:[#allocation2 + $0x1b8] sm:$0xff] }
 0x235   :  { %2182 = vmatprep.subr.mxu0 %v2594_v0 }
 0x236   :  { %2183 = vmatpush3.msra.mxu0 %v737_v11  ;;  %v1062_v11 = vld [vmem:[#allocation2 + $0x1b0] sm:$0xff] }
 0x237   :  { %2185 = vmatmul.mubr.f32.vlgmr.msra.gmra.mxu0 %v735_v12  ;;  %2222 = vmatprep.subr.mxu0 %v2594_v0  ;;  %v1061_v12 = vld [vmem:[#allocation2 + $0x1a8] sm:$0xff] }
 0x238   :  { %2254 = vmatprep.mubr.msk.f32.mxu0 %vm2595_vm0, %v2594_v0  ;;  %2223 = vmatpush3.msra.mxu0 %v952_v23  ;;  %v1157_v23 = vld [vmem:[#allocation5 + $0x188] sm:$0xff] }
 0x239   :  { %2224 = vmatprep.subr.mxu0 %v2594_v0 }
 0x23a   :  { %2225 = vmatpush3.msra.mxu0 %v951_v24 }
 0x23b   :  { %2226 = vmatprep.subr.mxu0 %v2594_v0 }
 0x23c   :  { %2227 = vmatpush3.msra.mxu0 %v950_v25  ;;  %v1156_v25 = vld [vmem:[#allocation5 + $0x180] sm:$0xff] }
 0x23d   :  { %2228 = vmatprep.subr.mxu0 %v2594_v0 }
 0x23e   :  { %2229 = vmatpush3.msra.mxu0 %v949_v26 }
 0x23f   :  { %2230 = vmatprep.subr.mxu0 %v2594_v0 }
 0x240   :  { %2231 = vmatpush3.msra.mxu0 %v948_v27 }
 0x241   :  { %2232 = vmatprep.subr.mxu0 %v2594_v0 }
 0x242   :  { %2233 = vmatpush3.msra.mxu0 %v947_v28  ;;  %v1271_v28 = vld [vmem:[#allocation7 + $0x1f8] sm:$0xff] }
 0x243   :  { %2234 = vmatprep.subr.mxu0 %v2594_v0 }
 0x2b7   :  { %v2842_v29 = vpop.f32.mrf.mxu0 }
 0x2b9   :  { %v2046_v30 = vpop.f32.mrf.mxu0 }
 0x2ba   :  { %v946_v30 = vld [vmem:[#allocation7 + $0x148] sm:$0xff] }
 0x2bb   :  { %2235 = vmatpush3.msra.mxu0 %v946_v30  ;;  %v1270_v30 = vld [vmem:[#allocation7 + $0x1f0] sm:$0xff] }
 0x2bc   :  { %2236 = vmatprep.subr.mxu0 %v2594_v0 }
 0x2d7   :  { %v607_v32 = vpop.f32.mrf.mxu0 }
 0x2d8   :  { %v608_v33 = vadd.f32 %v1666_v31, %v607_v32  ;;  %v945_v31 = vld [vmem:[#allocation7 + $0x140] sm:$0xff]  ;;  %v944_v32 = vld [vmem:[#allocation7 + $0x138] sm:$0xff] }
 0x2d9   :  { %v2116_v34 = vpop.f32.mrf.mxu0  ;;  %2237 = vmatpush3.msra.mxu0 %v945_v31  ;;  %v1269_v31 = vld [vmem:[#allocation7 + $0x1e8] sm:$0xff] }
 0x2da   :  { %v612_v35 = vmin.f32 %v608_v33, 0.0  ;;  %vm611_vm4 = vcmp.gt.f32.partialorder %v608_v33, 0.0  ;;  %2238 = vmatprep.subr.mxu0 %v2594_v0  ;;  %v942_v34 = vld [vmem:[#allocation7 + $0x128] sm:$0xff] }
 0x2db   :  { %2239 = vmatpush3.msra.mxu0 %v944_v32  ;;  %v1268_v32 = vld [vmem:[#allocation7 + $0x1e0] sm:$0xff] }
 0x2dc   :  { %v613_v36 = vmul.f32 1.442695, %v612_v35  ;;  %2240 = vmatprep.subr.mxu0 %v2594_v0  ;;  %v941_v35 = vld [vmem:[#allocation7 + $0x120] sm:$0xff] }
 0x2de   :  { %2481 = vpow2.f32 %v613_v36  ;;  %v940_v36 = vld [vmem:[#allocation7 + $0x118] sm:$0xff] }
 0x2eb   :  { %v2482_v37 = vpop.eup %2481 }
 0x2ec   :  { %v1667_v38 = vadd.f32 -1.0, %v2482_v37  ;;  %v939_v37 = vld [vmem:[#allocation7 + $0x110] sm:$0xff] }
 0x2ee   :  { %v616_v40 = vsel %vm611_vm4, %v608_v33, %v1667_v38  ;;  %v943_v33 = vld [vmem:[#allocation7 + $0x130] sm:$0xff]  ;;  %v938_v38 = vld [vmem:[#allocation7 + $0x108] sm:$0xff] }
 0x2ef   :  { %2150 = vmatmul.mubr.f32.vlgmr.msra.gmra.mxu1 %v616_v40  ;;  %2241 = vmatpush3.msra.mxu0 %v943_v33  ;;  %v1660_v40 = vld [vmem:[%s3202_s8] ss:$0 sm:$0xff]  ;;  %v1267_v33 = vld [vmem:[#allocation7 + $0x1d8] sm:$0xff] }
 0x2f0   :  { %2188 = vmatpush3.msra.mxu1 %v852_v39  ;;  %2219 = vmatprep.mubr.msk.f32.mxu1 %vm2595_vm0, %v2594_v0  ;;  %v937_v39 = vld [vmem:[#allocation7 + $0x100] sm:$0xff] }
 0x2f1   :  { %2189 = vmatprep.subr.mxu1 %v2594_v0  ;;  %2242 = vmatprep.subr.mxu0 %v2594_v0 }
 0x2f2   :  { %2190 = vmatpush3.msra.mxu1 %v851_v41  ;;  %2243 = vmatpush3.msra.mxu0 %v942_v34  ;;  %v391_v41 = vadd.f32 %v1660_v40, %v2842_v29  ;;  %v1266_v34 = vld [vmem:[#allocation7 + $0x1d0] sm:$0xff]  ;;  %v1260_v40 = vld [vmem:[#allocation7 + $0x1a0] sm:$0xff] }
 0x2f3   :  { %2191 = vmatprep.subr.mxu1 %v2594_v0  ;;  %2244 = vmatprep.subr.mxu0 %v2594_v0 }
 0x2f4   :  { %2192 = vmatpush3.msra.mxu1 %v850_v42  ;;  %2245 = vmatpush3.msra.mxu0 %v941_v35  ;;  %v395_v42 = vmin.f32 %v391_v41, 0.0  ;;  %vm394_vm6 = vcmp.gt.f32.partialorder %v391_v41, 0.0  ;;  %v1265_v35 = vld [vmem:[#allocation7 + $0x1c8] sm:$0xff] }
 0x2f5   :  { %2193 = vmatprep.subr.mxu1 %v2594_v0  ;;  %2246 = vmatprep.subr.mxu0 %v2594_v0 }
 0x2f6   :  { %2194 = vmatpush3.msra.mxu1 %v849_v43  ;;  %2247 = vmatpush3.msra.mxu0 %v940_v36  ;;  %v1668_v43 = vld [vmem:[%s3202_s8 + $0x1] ss:$0 sm:$0xff] }
 0x2f7   :  { %2195 = vmatprep.subr.mxu1 %v2594_v0  ;;  %v826_v46 = vpop.f32.mrf.mxu0  ;;  %2248 = vmatprep.subr.mxu0 %v2594_v0  ;;  %v1264_v36 = vld [vmem:[#allocation7 + $0x1c0] sm:$0xff] }
 0x2f8   :  { %v827_v48 = vadd.f32 %v1672_v44, %v826_v46  ;;  %2196 = vmatpush3.msra.mxu1 %v848_v45  ;;  %2249 = vmatpush3.msra.mxu0 %v939_v37  ;;  %v396_v44 = vmul.f32 1.442695, %v395_v42  ;;  %v1263_v37 = vld [vmem:[#allocation7 + $0x1b8] sm:$0xff]  ;;  %v1258_v42 = vld [vmem:[#allocation7 + $0x190] sm:$0xff] }
 0x2f9   :  { %2197 = vmatprep.subr.mxu1 %v2594_v0  ;;  %v2186_v49 = vpop.f32.mrf.mxu0  ;;  %2250 = vmatprep.subr.mxu0 %v2594_v0 }
 0x2fa   :  { %v831_v51 = vmin.f32 %v827_v48, 0.0  ;;  %2198 = vmatpush3.msra.mxu1 %v847_v47  ;;  %vm830_vm5 = vcmp.gt.f32.partialorder %v827_v48, 0.0  ;;  %2251 = vmatpush3.msra.mxu0 %v938_v38  ;;  %v1262_v38 = vld [vmem:[#allocation7 + $0x1b0] sm:$0xff] }
 0x2fb   :  { %2199 = vmatprep.subr.mxu1 %v2594_v0  ;;  %2252 = vmatprep.subr.mxu0 %v2594_v0 }
 0x2fc   :  { %v832_v53 = vmul.f32 1.442695, %v831_v51  ;;  %2200 = vmatpush3.msra.mxu1 %v846_v50  ;;  %2253 = vmatpush3.msra.mxu0 %v937_v39  ;;  %v1261_v39 = vld [vmem:[#allocation7 + $0x1a8] sm:$0xff] }
 0x2fd   :  { %2201 = vmatprep.subr.mxu1 %v2594_v0  ;;  %2292 = vmatprep.subr.mxu0 %v2594_v0 }
 0x2fe   :  { %2483 = vpow2.f32 %v832_v53  ;;  %2202 = vmatpush3.msra.mxu1 %v845_v52 }
 0x2ff   :  { %2203 = vmatprep.subr.mxu1 %v2594_v0  ;;  %2485 = vpow2.f32 %v396_v44  ;;  %v1256_v44 = vld [vmem:[#allocation7 + $0x180] sm:$0xff] }
 0x300   :  { %2204 = vmatpush3.msra.mxu1 %v844_v54 }
 0x301   :  { %2205 = vmatprep.subr.mxu1 %v2594_v0 }
 0x302   :  { %2206 = vmatpush3.msra.mxu1 %v843_v55 }
 0x303   :  { %2207 = vmatprep.subr.mxu1 %v2594_v0 }
 0x304   :  { %2208 = vmatpush3.msra.mxu1 %v842_v56 }
 0x305   :  { %2209 = vmatprep.subr.mxu1 %v2594_v0 }
 0x306   :  { %2210 = vmatpush3.msra.mxu1 %v841_v57  ;;  %v1674_v57 = vld [vmem:[%s3200_s6 + $0x2] ss:$0 sm:$0xff] }
 0x307   :  { %2211 = vmatprep.subr.mxu1 %v2594_v0 }
 0x308   :  { %2212 = vmatpush3.msra.mxu1 %v840_v58 }
 0x309   :  { %2213 = vmatprep.subr.mxu1 %v2594_v0 }
 0x30a   :  { %2214 = vmatpush3.msra.mxu1 %v839_v59 }
 0x30b   :  { %v2484_v61 = vpop.eup %2483  ;;  %2215 = vmatprep.subr.mxu1 %v2594_v0 }
 0x30c   :  { %2216 = vmatpush3.msra.mxu1 %v838_v60  ;;  %v1673_v63 = vadd.f32 -1.0, %v2484_v61  ;;  %v2486_v50 = vpop.eup %2485 }
 0x30d   :  { %2217 = vmatprep.subr.mxu1 %v2594_v0  ;;  %v1661_v51 = vadd.f32 -1.0, %v2486_v50 }
 0x30e   :  { %2218 = vmatpush3.msra.mxu1 %v837_v62  ;;  %v835_v2 = vsel %vm830_vm5, %v827_v48, %v1673_v63 }
 0x30f   :  { %2257 = vmatprep.subr.mxu1 %v2594_v0  ;;  %2220 = vmatmul.mubr.f32.vlgmr.msra.gmra.mxu1 %v835_v2  ;;  %v2920_v29 = vsel %vm394_vm6, %v391_v41, %v1661_v51  ;;  %v1171_v2 = vld [vmem:[#allocation5 + $0x1f8] sm:$0xff] }
 0x310   :  { %2258 = vmatpush3.msra.mxu1 %v1071_v1  ;;  %2289 = vmatprep.mubr.msk.f32.mxu1 %vm2595_vm0, %v2594_v0  ;;  %v1259_v41 = vld [vmem:[#allocation7 + $0x198] sm:$0xff] }
 0x311   :  { %2259 = vmatprep.subr.mxu1 %v2594_v0 }
 0x312   :  { %2260 = vmatpush3.msra.mxu1 %v1070_v3 }
 0x313   :  { %2261 = vmatprep.subr.mxu1 %v2594_v0 }
 0x314   :  { %2262 = vmatpush3.msra.mxu1 %v1069_v4  ;;  %v1170_v4 = vld [vmem:[#allocation5 + $0x1f0] sm:$0xff] }
 0x315   :  { %2263 = vmatprep.subr.mxu1 %v2594_v0 }
 0x316   :  { %2264 = vmatpush3.msra.mxu1 %v1068_v5  ;;  %v1169_v5 = vld [vmem:[#allocation5 + $0x1e8] sm:$0xff] }
 0x317   :  { %2265 = vmatprep.subr.mxu1 %v2594_v0 }
 0x318   :  { %2266 = vmatpush3.msra.mxu1 %v1067_v6  ;;  %v1168_v6 = vld [vmem:[#allocation5 + $0x1e0] sm:$0xff] }
 0x319   :  { %2267 = vmatprep.subr.mxu1 %v2594_v0 }
 0x31a   :  { %2268 = vmatpush3.msra.mxu1 %v1066_v7  ;;  %v1680_v7 = vld [vmem:[%s3198_s4 + $0x3] ss:$0 sm:$0xff] }
 0x31b   :  { %2269 = vmatprep.subr.mxu1 %v2594_v0 }
 0x31c   :  { %2270 = vmatpush3.msra.mxu1 %v1065_v8  ;;  %v1167_v8 = vld [vmem:[#allocation5 + $0x1d8] sm:$0xff] }
 0x31d   :  { %2271 = vmatprep.subr.mxu1 %v2594_v0 }
 0x31e   :  { %2272 = vmatpush3.msra.mxu1 %v1064_v9 }
 0x31f   :  { %2273 = vmatprep.subr.mxu1 %v2594_v0 }
 0x320   :  { %2274 = vmatpush3.msra.mxu1 %v1063_v10  ;;  %v1166_v10 = vld [vmem:[#allocation5 + $0x1d0] sm:$0xff] }
 0x321   :  { %2275 = vmatprep.subr.mxu1 %v2594_v0 }
 0x322   :  { %2276 = vmatpush3.msra.mxu1 %v1062_v11 }
 0x323   :  { %2277 = vmatprep.subr.mxu1 %v2594_v0 }
 0x324   :  { %2278 = vmatpush3.msra.mxu1 %v1061_v12 }
 0x325   :  { %2279 = vmatprep.subr.mxu1 %v2594_v0 }
 0x326   :  { %2280 = vmatpush3.msra.mxu1 %v1060_v13  ;;  %v1165_v13 = vld [vmem:[#allocation5 + $0x1c8] sm:$0xff] }
 0x327   :  { %2281 = vmatprep.subr.mxu1 %v2594_v0 }
 0x328   :  { %2282 = vmatpush3.msra.mxu1 %v1059_v16 }
 0x329   :  { %2283 = vmatprep.subr.mxu1 %v2594_v0 }
 0x32a   :  { %2284 = vmatpush3.msra.mxu1 %v1058_v17  ;;  %v1163_v17 = vld [vmem:[#allocation5 + $0x1b8] sm:$0xff] }
 0x32b   :  { %2285 = vmatprep.subr.mxu1 %v2594_v0 }
 0x32c   :  { %2286 = vmatpush3.msra.mxu1 %v1057_v20  ;;  %v1160_v20 = vld [vmem:[#allocation5 + $0x1a0] sm:$0xff] }
 0x32d   :  { %2287 = vmatprep.subr.mxu1 %v2594_v0 }
 0x32e   :  { %2288 = vmatpush3.msra.mxu1 %v1056_v21  ;;  %v1159_v21 = vld [vmem:[#allocation5 + $0x198] sm:$0xff] }
 0x32f   :  { %2290 = vmatmul.mubr.f32.vlgmr.msra.gmra.mxu1 %v1054_v22  ;;  %2327 = vmatprep.subr.mxu1 %v2594_v0  ;;  %v1158_v22 = vld [vmem:[#allocation5 + $0x190] sm:$0xff] }
 0x330   :  { %2359 = vmatprep.mubr.msk.f32.mxu1 %vm2595_vm0, %v2594_v0  ;;  %2328 = vmatpush3.msra.mxu1 %v1271_v28  ;;  %v1360_v28 = vld [vmem:[%s3203_s9 + $0x10] sm:$0xff] }
 0x331   :  { %2329 = vmatprep.subr.mxu1 %v2594_v0 }
 0x332   :  { %2330 = vmatpush3.msra.mxu1 %v1270_v30  ;;  %v1375_v30 = vld [vmem:[%s3204_s10 + $0x8] sm:$0xff] }
 0x333   :  { %2331 = vmatprep.subr.mxu1 %v2594_v0 }
 0x334   :  { %2332 = vmatpush3.msra.mxu1 %v1269_v31  ;;  %v1359_v31 = vld [vmem:[%s3203_s9 + $0x8] sm:$0xff] }
 0x335   :  { %2333 = vmatprep.subr.mxu1 %v2594_v0 }
 0x336   :  { %2334 = vmatpush3.msra.mxu1 %v1268_v32  ;;  %v1374_v32 = vld [vmem:[%s3204_s10] sm:$0xff] }
 0x337   :  { %2335 = vmatprep.subr.mxu1 %v2594_v0 }
 0x338   :  { %2336 = vmatpush3.msra.mxu1 %v1267_v33  ;;  %v1358_v33 = vld [vmem:[%s3203_s9] sm:$0xff] }
 0x339   :  { %2337 = vmatprep.subr.mxu1 %v2594_v0 }
 0x33a   :  { %2338 = vmatpush3.msra.mxu1 %v1266_v34  ;;  %v1684_v34 = vld [vmem:[%s3202_s8 + $0x3] ss:$0 sm:$0xff] }
 0x33b   :  { %2339 = vmatprep.subr.mxu1 %v2594_v0 }
 0x33c   :  { %2340 = vmatpush3.msra.mxu1 %v1265_v35 }
 0x33d   :  { %2341 = vmatprep.subr.mxu1 %v2594_v0 }
 0x33e   :  { %2342 = vmatpush3.msra.mxu1 %v1264_v36 }
 0x33f   :  { %2343 = vmatprep.subr.mxu1 %v2594_v0 }
 0x340   :  { %2344 = vmatpush3.msra.mxu1 %v1263_v37 }
 0x341   :  { %2345 = vmatprep.subr.mxu1 %v2594_v0 }
 0x342   :  { %2346 = vmatpush3.msra.mxu1 %v1262_v38 }
 0x343   :  { %2347 = vmatprep.subr.mxu1 %v2594_v0 }
 0x344   :  { %2348 = vmatpush3.msra.mxu1 %v1261_v39 }
 0x345   :  { %2349 = vmatprep.subr.mxu1 %v2594_v0 }
 0x346   :  { %2350 = vmatpush3.msra.mxu1 %v1260_v40 }
 0x347   :  { %2351 = vmatprep.subr.mxu1 %v2594_v0 }
 0x348   :  { %2352 = vmatpush3.msra.mxu1 %v1259_v41 }
 0x349   :  { %2353 = vmatprep.subr.mxu1 %v2594_v0 }
 0x34a   :  { %2354 = vmatpush3.msra.mxu1 %v1258_v42 }
 0x34b   :  { %2355 = vmatprep.subr.mxu1 %v2594_v0 }
 0x3af   :  { %v707_v45 = vpop.f32.mrf.mxu1 }
 0x3b0   :  { %v708_v46 = vadd.f32 %v1668_v43, %v707_v45  ;;  %v1257_v43 = vld [vmem:[#allocation7 + $0x188] sm:$0xff]  ;;  %v1389_v45 = vld [vmem:[%s3204_s10 + $0x78] sm:$0xff] }
 0x3b1   :  { %v2151_v47 = vpop.f32.mrf.mxu1  ;;  %2356 = vmatpush3.msra.mxu1 %v1257_v43 }
 0x3b2   :  { %v712_v48 = vmin.f32 %v708_v46, 0.0  ;;  %vm711_vm7 = vcmp.gt.f32.partialorder %v708_v46, 0.0  ;;  %2357 = vmatprep.subr.mxu1 %v2594_v0  ;;  %v1387_v47 = vld [vmem:[%s3204_s10 + $0x68] sm:$0xff] }
 0x3b3   :  { %2358 = vmatpush3.msra.mxu1 %v1256_v44 }
 0x3b4   :  { %v713_v49 = vmul.f32 1.442695, %v712_v48  ;;  %2397 = vmatprep.subr.mxu1 %v2594_v0  ;;  %v1676_v48 = vld [vmem:[%s3202_s8 + $0x2] ss:$0 sm:$0xff] }
 0x3b6   :  { %2487 = vpow2.f32 %v713_v49 }
 0x3c3   :  { %v2488_v52 = vpop.eup %2487 }
 0x3c4   :  { %v1669_v53 = vadd.f32 -1.0, %v2488_v52 }
 0x3c6   :  { %v2922_v54 = vsel %vm711_vm7, %v708_v46, %v1669_v53  ;;  %v1388_v46 = vld [vmem:[%s3204_s10 + $0x70] sm:$0xff] }
 0x3c7   :  { %v2926_v55 = vadd.f32 %v2922_v54, %v2920_v29  ;;  %v718_v56 = vmax.f32 %v2920_v29, %v2922_v54  ;;  %v1372_v54 = vld [vmem:[%s3203_s9 + $0x70] sm:$0xff] }
 0x3cf   :  { %v926_v58 = vpop.f32.mrf.mxu1 }
 0x3d0   :  { %v927_v59 = vadd.f32 %v1674_v57, %v926_v58 }
 0x3d1   :  { %v2221_v60 = vpop.f32.mrf.mxu1 }
 0x3d2   :  { %v931_v61 = vmin.f32 %v927_v59, 0.0  ;;  %vm930_vm8 = vcmp.gt.f32.partialorder %v927_v59, 0.0 }
 0x3d4   :  { %v932_v62 = vmul.f32 1.442695, %v931_v61 }
 0x3d6   :  { %2489 = vpow2.f32 %v932_v62  ;;  %v1682_v62 = vld [vmem:[%s3200_s6 + $0x3] ss:$0 sm:$0xff] }
 0x3e3   :  { %v2490_v63 = vpop.eup %2489 }
 0x3e4   :  { %v1675_v1 = vadd.f32 -1.0, %v2490_v63 }
 0x3e6   :  { %v935_v3 = vsel %vm930_vm8, %v927_v59, %v1675_v1 }
 0x3e7   :  { %2255 = vmatmul.mubr.f32.vlgmr.msra.gmra.mxu0 %v935_v3 }
 0x3e8   :  { %2293 = vmatpush3.msra.mxu0 %v1171_v2  ;;  %2324 = vmatprep.mubr.msk.f32.mxu0 %vm2595_vm0, %v2594_v0 }
 0x3e9   :  { %2294 = vmatprep.subr.mxu0 %v2594_v0 }
 0x3ea   :  { %2295 = vmatpush3.msra.mxu0 %v1170_v4 }
 0x3eb   :  { %2296 = vmatprep.subr.mxu0 %v2594_v0 }
 0x3ec   :  { %2297 = vmatpush3.msra.mxu0 %v1169_v5 }
 0x3ed   :  { %2298 = vmatprep.subr.mxu0 %v2594_v0 }
 0x3ee   :  { %2299 = vmatpush3.msra.mxu0 %v1168_v6 }
 0x3ef   :  { %v1145_v9 = vpop.f32.mrf.mxu1  ;;  %2300 = vmatprep.subr.mxu0 %v2594_v0 }
 0x3f0   :  { %v1146_v11 = vadd.f32 %v1680_v7, %v1145_v9  ;;  %2301 = vmatpush3.msra.mxu0 %v1167_v8  ;;  %v1386_v7 = vld [vmem:[%s3204_s10 + $0x60] sm:$0xff]  ;;  %v1385_v9 = vld [vmem:[%s3204_s10 + $0x58] sm:$0xff] }
 0x3f1   :  { %v2291_v12 = vpop.f32.mrf.mxu1  ;;  %2302 = vmatprep.subr.mxu0 %v2594_v0  ;;  %v1370_v8 = vld [vmem:[%s3203_s9 + $0x60] sm:$0xff] }
 0x3f2   :  { %v1150_v14 = vmin.f32 %v1146_v11, 0.0  ;;  %2303 = vmatpush3.msra.mxu0 %v1166_v10  ;;  %vm1149_vm9 = vcmp.gt.f32.partialorder %v1146_v11, 0.0  ;;  %v1369_v10 = vld [vmem:[%s3203_s9 + $0x58] sm:$0xff]  ;;  %v1368_v12 = vld [vmem:[%s3203_s9 + $0x50] sm:$0xff] }
 0x3f3   :  { %2304 = vmatprep.subr.mxu0 %v2594_v0 }
 0x3f4   :  { %v1151_v16 = vmul.f32 1.442695, %v1150_v14  ;;  %2305 = vmatpush3.msra.mxu0 %v1165_v13  ;;  %v1383_v13 = vld [vmem:[%s3204_s10 + $0x48] sm:$0xff] }
 0x3f5   :  { %2306 = vmatprep.subr.mxu0 %v2594_v0  ;;  %v1367_v14 = vld [vmem:[%s3203_s9 + $0x48] sm:$0xff] }
 0x3f6   :  { %2491 = vpow2.f32 %v1151_v16  ;;  %2307 = vmatpush3.msra.mxu0 %v1164_v15  ;;  %v1382_v15 = vld [vmem:[%s3204_s10 + $0x40] sm:$0xff] }
 0x3f7   :  { %2308 = vmatprep.subr.mxu0 %v2594_v0  ;;  %v1366_v16 = vld [vmem:[%s3203_s9 + $0x40] sm:$0xff] }
 0x3f8   :  { %2309 = vmatpush3.msra.mxu0 %v1163_v17  ;;  %v1381_v17 = vld [vmem:[%s3204_s10 + $0x38] sm:$0xff] }
 0x3f9   :  { %2310 = vmatprep.subr.mxu0 %v2594_v0 }
 0x3fa   :  { %2311 = vmatpush3.msra.mxu0 %v1162_v18  ;;  %v1365_v18 = vld [vmem:[%s3203_s9 + $0x38] sm:$0xff] }
 0x3fb   :  { %2312 = vmatprep.subr.mxu0 %v2594_v0 }
 0x3fc   :  { %2313 = vmatpush3.msra.mxu0 %v1161_v19  ;;  %v1380_v19 = vld [vmem:[%s3204_s10 + $0x30] sm:$0xff] }
 0x3fd   :  { %2314 = vmatprep.subr.mxu0 %v2594_v0 }
 0x3fe   :  { %2315 = vmatpush3.msra.mxu0 %v1160_v20  ;;  %v1364_v20 = vld [vmem:[%s3203_s9 + $0x30] sm:$0xff] }
 0x3ff   :  { %2316 = vmatprep.subr.mxu0 %v2594_v0 }
 0x400   :  { %2317 = vmatpush3.msra.mxu0 %v1159_v21  ;;  %v1379_v21 = vld [vmem:[%s3204_s10 + $0x28] sm:$0xff] }
 0x401   :  { %2318 = vmatprep.subr.mxu0 %v2594_v0 }
 0x402   :  { %2319 = vmatpush3.msra.mxu0 %v1158_v22  ;;  %v1363_v22 = vld [vmem:[%s3203_s9 + $0x28] sm:$0xff] }
 0x403   :  { %v2492_v24 = vpop.eup %2491  ;;  %2320 = vmatprep.subr.mxu0 %v2594_v0 }
 0x404   :  { %2321 = vmatpush3.msra.mxu0 %v1157_v23  ;;  %v1681_v26 = vadd.f32 -1.0, %v2492_v24  ;;  %v1378_v23 = vld [vmem:[%s3204_s10 + $0x20] sm:$0xff] }
 0x405   :  { %2322 = vmatprep.subr.mxu0 %v2594_v0  ;;  %v1362_v24 = vld [vmem:[%s3203_s9 + $0x20] sm:$0xff] }
 0x406   :  { %2323 = vmatpush3.msra.mxu0 %v1156_v25  ;;  %v1154_v27 = vsel %vm1149_vm9, %v1146_v11, %v1681_v26  ;;  %v1384_v11 = vld [vmem:[%s3204_s10 + $0x50] sm:$0xff]  ;;  %v1377_v25 = vld [vmem:[%s3204_s10 + $0x18] sm:$0xff] }
 0x407   :  { %2325 = vmatmul.mubr.f32.vlgmr.msra.gmra.mxu0 %v1154_v27  ;;  %2362 = vmatprep.subr.mxu0 %v2594_v0  ;;  %v1361_v26 = vld [vmem:[%s3203_s9 + $0x18] sm:$0xff]  ;;  %v1376_v27 = vld [vmem:[%s3204_s10 + $0x10] sm:$0xff] }
 0x408   :  { %2394 = vmatprep.mubr.msk.f32.mxu0 %vm2595_vm0, %v2594_v0  ;;  %2363 = vmatpush3.msra.mxu0 %v1389_v45  ;;  %v1545_v45 = vld [vmem:[%s3205_s11 + $0x78] sm:$0xff] }
 0x409   :  { %2364 = vmatprep.subr.mxu0 %v2594_v0 }
 0x40a   :  { %2365 = vmatpush3.msra.mxu0 %v1388_v46  ;;  %v1544_v46 = vld [vmem:[%s3205_s11 + $0x70] sm:$0xff] }
 0x40b   :  { %2366 = vmatprep.subr.mxu0 %v2594_v0 }
 0x40c   :  { %2367 = vmatpush3.msra.mxu0 %v1387_v47  ;;  %v1543_v47 = vld [vmem:[%s3205_s11 + $0x68] sm:$0xff] }
 0x40d   :  { %2368 = vmatprep.subr.mxu0 %v2594_v0 }
 0x40e   :  { %2369 = vmatpush3.msra.mxu0 %v1386_v7 }
 0x40f   :  { %2370 = vmatprep.subr.mxu0 %v2594_v0 }
 0x410   :  { %2371 = vmatpush3.msra.mxu0 %v1385_v9 }
 0x411   :  { %2372 = vmatprep.subr.mxu0 %v2594_v0 }
 0x412   :  { %2373 = vmatpush3.msra.mxu0 %v1384_v11 }
 0x413   :  { %2374 = vmatprep.subr.mxu0 %v2594_v0 }
 0x414   :  { %2375 = vmatpush3.msra.mxu0 %v1383_v13 }
 0x415   :  { %2376 = vmatprep.subr.mxu0 %v2594_v0 }
 0x416   :  { %2377 = vmatpush3.msra.mxu0 %v1382_v15 }
 0x417   :  { %2378 = vmatprep.subr.mxu0 %v2594_v0 }
 0x418   :  { %2379 = vmatpush3.msra.mxu0 %v1381_v17 }
 0x419   :  { %2380 = vmatprep.subr.mxu0 %v2594_v0 }
 0x41a   :  { %2381 = vmatpush3.msra.mxu0 %v1380_v19 }
 0x41b   :  { %2382 = vmatprep.subr.mxu0 %v2594_v0 }
 0x41c   :  { %2383 = vmatpush3.msra.mxu0 %v1379_v21 }
 0x41d   :  { %2384 = vmatprep.subr.mxu0 %v2594_v0 }
 0x41e   :  { %2385 = vmatpush3.msra.mxu0 %v1378_v23 }
 0x41f   :  { %2386 = vmatprep.subr.mxu0 %v2594_v0 }
 0x420   :  { %2387 = vmatpush3.msra.mxu0 %v1377_v25 }
 0x421   :  { %2388 = vmatprep.subr.mxu0 %v2594_v0 }
 0x422   :  { %2389 = vmatpush3.msra.mxu0 %v1376_v27 }
 0x423   :  { %2390 = vmatprep.subr.mxu0 %v2594_v0 }
 0x424   :  { %2391 = vmatpush3.msra.mxu0 %v1375_v30 }
 0x425   :  { %2392 = vmatprep.subr.mxu0 %v2594_v0 }
 0x426   :  { %2393 = vmatpush3.msra.mxu0 %v1374_v32 }
 0x427   :  { %2432 = vmatprep.subr.mxu0 %v2594_v0 }
 0x4a7   :  { %v1026_v49 = vpop.f32.mrf.mxu0 }
 0x4a8   :  { %v1027_v50 = vadd.f32 %v1676_v48, %v1026_v49  ;;  %v1542_v48 = vld [vmem:[%s3205_s11 + $0x60] sm:$0xff]  ;;  %v1541_v49 = vld [vmem:[%s3205_s11 + $0x58] sm:$0xff] }
 0x4a9   :  { %v2256_v51 = vpop.f32.mrf.mxu0 }
 0x4aa   :  { %v1031_v52 = vmin.f32 %v1027_v50, 0.0  ;;  %vm1030_vm10 = vcmp.gt.f32.partialorder %v1027_v50, 0.0  ;;  %v1539_v51 = vld [vmem:[%s3205_s11 + $0x48] sm:$0xff] }
 0x4ac   :  { %v1032_v53 = vmul.f32 1.442695, %v1031_v52  ;;  %v1538_v52 = vld [vmem:[%s3205_s11 + $0x40] sm:$0xff] }
 0x4ae   :  { %2493 = vpow2.f32 %v1032_v53  ;;  %v1537_v53 = vld [vmem:[%s3205_s11 + $0x38] sm:$0xff] }
 0x4bb   :  { %v2494_v57 = vpop.eup %2493 }
 0x4bc   :  { %v1677_v58 = vadd.f32 -1.0, %v2494_v57  ;;  %v1536_v57 = vld [vmem:[%s3205_s11 + $0x30] sm:$0xff] }
 0x4be   :  { %v1035_v59 = vsel %vm1030_vm10, %v1027_v50, %v1677_v58  ;;  %v1540_v50 = vld [vmem:[%s3205_s11 + $0x50] sm:$0xff]  ;;  %v1535_v58 = vld [vmem:[%s3205_s11 + $0x28] sm:$0xff] }
 0x4bf   :  { %v2988_v60 = vadd.f32 %v1035_v59, %v2926_v55  ;;  %v2993_v61 = vmax.f32 %v718_v56, %v1035_v59  ;;  %v1373_v55 = vld [vmem:[%s3203_s9 + $0x78] sm:$0xff]  ;;  %v1371_v56 = vld [vmem:[%s3203_s9 + $0x68] sm:$0xff]  ;;  %v1534_v59 = vld [vmem:[%s3205_s11 + $0x20] sm:$0xff] }
 0x4c7   :  { %v1245_v63 = vpop.f32.mrf.mxu0 }
 0x4c8   :  { %v1246_v1 = vadd.f32 %v1682_v62, %v1245_v63  ;;  %v1531_v62 = vld [vmem:[%s3205_s11 + $0x8] sm:$0xff]  ;;  %v1530_v63 = vld [vmem:[%s3205_s11] sm:$0xff] }
 0x4c9   :  { %v2326_v2 = vpop.f32.mrf.mxu0 }
 0x4ca   :  { %v1250_v3 = vmin.f32 %v1246_v1, 0.0  ;;  %vm1249_vm11 = vcmp.gt.f32.partialorder %v1246_v1, 0.0 }
 0x4cc   :  { %v1251_v4 = vmul.f32 1.442695, %v1250_v3 }
 0x4ce   :  { %2495 = vpow2.f32 %v1251_v4 }
 0x4db   :  { %v2496_v5 = vpop.eup %2495 }
 0x4dc   :  { %v1683_v6 = vadd.f32 -1.0, %v2496_v5 }
 0x4de   :  { %v1254_v29 = vsel %vm1249_vm11, %v1246_v1, %v1683_v6 }
 0x4df   :  { %2360 = vmatmul.mubr.f32.vlgmr.msra.gmra.mxu1 %v1254_v29  ;;  %v1686_v29 = vld [vmem:[%s3206_s12] ss:$0 sm:$0xff] }
 0x4e0   :  { %2398 = vmatpush3.msra.mxu1 %v1373_v55  ;;  %2429 = vmatprep.mubr.msk.f32.mxu1 %vm2595_vm0, %v2594_v0 }
 0x4e1   :  { %2399 = vmatprep.subr.mxu1 %v2594_v0 }
 0x4e2   :  { %2400 = vmatpush3.msra.mxu1 %v1372_v54 }
 0x4e3   :  { %2401 = vmatprep.subr.mxu1 %v2594_v0 }
 0x4e4   :  { %2402 = vmatpush3.msra.mxu1 %v1371_v56 }
 0x4e5   :  { %2403 = vmatprep.subr.mxu1 %v2594_v0 }
 0x4e6   :  { %2404 = vmatpush3.msra.mxu1 %v1370_v8 }
 0x4e7   :  { %2405 = vmatprep.subr.mxu1 %v2594_v0 }
 0x4e8   :  { %2406 = vmatpush3.msra.mxu1 %v1369_v10 }
 0x4e9   :  { %2407 = vmatprep.subr.mxu1 %v2594_v0 }
 0x4ea   :  { %2408 = vmatpush3.msra.mxu1 %v1368_v12 }
 0x4eb   :  { %2409 = vmatprep.subr.mxu1 %v2594_v0 }
 0x4ec   :  { %2410 = vmatpush3.msra.mxu1 %v1367_v14 }
 0x4ed   :  { %2411 = vmatprep.subr.mxu1 %v2594_v0 }
 0x4ee   :  { %2412 = vmatpush3.msra.mxu1 %v1366_v16 }
 0x4ef   :  { %2413 = vmatprep.subr.mxu1 %v2594_v0 }
 0x4f0   :  { %2414 = vmatpush3.msra.mxu1 %v1365_v18 }
 0x4f1   :  { %2415 = vmatprep.subr.mxu1 %v2594_v0 }
 0x4f2   :  { %2416 = vmatpush3.msra.mxu1 %v1364_v20 }
 0x4f3   :  { %2417 = vmatprep.subr.mxu1 %v2594_v0 }
 0x4f4   :  { %2418 = vmatpush3.msra.mxu1 %v1363_v22 }
 0x4f5   :  { %2419 = vmatprep.subr.mxu1 %v2594_v0 }
 0x4f6   :  { %2420 = vmatpush3.msra.mxu1 %v1362_v24 }
 0x4f7   :  { %2421 = vmatprep.subr.mxu1 %v2594_v0 }
 0x4f8   :  { %2422 = vmatpush3.msra.mxu1 %v1361_v26 }
 0x4f9   :  { %2423 = vmatprep.subr.mxu1 %v2594_v0 }
 0x4fa   :  { %2424 = vmatpush3.msra.mxu1 %v1360_v28 }
 0x4fb   :  { %2425 = vmatprep.subr.mxu1 %v2594_v0 }
 0x4fc   :  { %2426 = vmatpush3.msra.mxu1 %v1359_v31 }
 0x4fd   :  { %2427 = vmatprep.subr.mxu1 %v2594_v0 }
 0x4fe   :  { %2428 = vmatpush3.msra.mxu1 %v1358_v33 }
 0x59f   :  { %v1345_v35 = vpop.f32.mrf.mxu1 }
 0x5a0   :  { %v1346_v36 = vadd.f32 %v1684_v34, %v1345_v35 }
 0x5a1   :  { %v2361_v37 = vpop.f32.mrf.mxu1 }
 0x5a2   :  { %v1350_v38 = vmin.f32 %v1346_v36, 0.0  ;;  %vm1349_vm12 = vcmp.gt.f32.partialorder %v1346_v36, 0.0 }
 0x5a4   :  { %v1351_v39 = vmul.f32 1.442695, %v1350_v38 }
 0x5a6   :  { %2497 = vpow2.f32 %v1351_v39 }
 0x5b3   :  { %v2498_v40 = vpop.eup %2497 }
 0x5b4   :  { %v1685_v41 = vadd.f32 -1.0, %v2498_v40 }
 0x5b6   :  { %v1354_v42 = vsel %vm1349_vm12, %v1346_v36, %v1685_v41 }
 0x5b7   :  { %v1355_v43 = vadd.f32 %v1354_v42, %v2988_v60  ;;  %v1356_v44 = vmax.f32 %v2993_v61, %v1354_v42  ;;  %v1533_v60 = vld [vmem:[%s3205_s11 + $0x18] sm:$0xff]  ;;  %v1532_v61 = vld [vmem:[%s3205_s11 + $0x10] sm:$0xff]  ;;  %s2596_s11 = smov [#allocation8]  }
 0x5b8   :  { %s1644_s22 = sshll.u32 %s2596_s11, 4  ;;  %s1645_s22 = int_to_ptr.vmem [resolvable:$true] %s1644_s22 }
 0x5b9   :  { %2395 = vmatmul.mubr.f32.vlgmr.msra.gmra.mxu0 %v1356_v44  ;;  %2430 = vmatmul.mubr.f32.vlgmr.msra.gmra.mxu1 %v1355_v43  ;;  %v1357_v1 = vmul.f32 0.25, %v1355_v43  ;;  %s2563_s12 = scalar_lea.vmem %s1645_s22, 32  ;;  %p2568_p2 = scmp.lt.s32.totalorder %s1645_s22, %s1645_s22 }
 0x5ba   :  { %2433 = vmatpush3.msra.mxu0 %v1545_v45  ;;  %2464 = vmatprep.mubr.msk.f32.mxu0 %vm2595_vm0, %v2594_v0  ;;  %p2564_p1 = scmp.ne.s32.totalorder %s1645_s22, %s2563_s12  ;;  %p2569_p3 = scmp.lt.s32.totalorder %s2563_s12, %s2563_s12 }
 0x5bb   :  { %2434 = vmatprep.subr.mxu0 %v2594_v0 }
 0x5bc   :  { %2435 = vmatpush3.msra.mxu0 %v1544_v46  ;;  %p2570_p4 = por %p2569_p3, %p2568_p2 }
 0x5bd   :  { %2436 = vmatprep.subr.mxu0 %v2594_v0 }
 0x5be   :  { %2437 = vmatpush3.msra.mxu0 %v1543_v47  ;;  %p2571_p5 = pnand %p2570_p4, %p2564_p1 }
 0x5bf   :  { %2438 = vmatprep.subr.mxu0 %v2594_v0 }
 0x5c0   :  { %2439 = vmatpush3.msra.mxu0 %v1542_v48 }
 0x5c1   :  { %2440 = vmatprep.subr.mxu0 %v2594_v0 }
 0x5c2   :  { %2441 = vmatpush3.msra.mxu0 %v1541_v49 }
 0x5c3   :  { %2442 = vmatprep.subr.mxu0 %v2594_v0 }
 0x5c4   :  { %2443 = vmatpush3.msra.mxu0 %v1540_v50 }
 0x5c5   :  { %2444 = vmatprep.subr.mxu0 %v2594_v0 }
 0x5c6   :  { %2445 = vmatpush3.msra.mxu0 %v1539_v51 }
 0x5c7   :  { %2446 = vmatprep.subr.mxu0 %v2594_v0 }
 0x5c8   :  { %2447 = vmatpush3.msra.mxu0 %v1538_v52 }
 0x5c9   :  { %2448 = vmatprep.subr.mxu0 %v2594_v0 }
 0x5ca   :  { %2449 = vmatpush3.msra.mxu0 %v1537_v53 }
 0x5cb   :  { %2450 = vmatprep.subr.mxu0 %v2594_v0 }
 0x5cc   :  { %2451 = vmatpush3.msra.mxu0 %v1536_v57 }
 0x5cd   :  { %2452 = vmatprep.subr.mxu0 %v2594_v0 }
 0x5ce   :  { %2453 = vmatpush3.msra.mxu0 %v1535_v58 }
 0x5cf   :  { %2454 = vmatprep.subr.mxu0 %v2594_v0 }
 0x5d0   :  { %2455 = vmatpush3.msra.mxu0 %v1534_v59 }
 0x5d1   :  { %2456 = vmatprep.subr.mxu0 %v2594_v0 }
 0x5d2   :  { %2457 = vmatpush3.msra.mxu0 %v1533_v60 }
 0x5d3   :  { %2458 = vmatprep.subr.mxu0 %v2594_v0 }
 0x5d4   :  { %2459 = vmatpush3.msra.mxu0 %v1532_v61 }
 0x5d5   :  { %2460 = vmatprep.subr.mxu0 %v2594_v0 }
 0x5d6   :  { %2461 = vmatpush3.msra.mxu0 %v1531_v62 }
 0x5d7   :  { %2462 = vmatprep.subr.mxu0 %v2594_v0 }
 0x5d8   :  { %2463 = vmatpush3.msra.mxu0 %v1530_v63 }
 0x5d9   :  { %2465 = vmatmul.mubr.f32.vlgmr.msra.gmra.mxu0 %v1357_v1 }
 0x679   :  { %v1456_v2 = vpop.f32.mrf.mxu0  ;;  %v1526_v3 = vpop.f32.mrf.mxu1 }
 0x67a   :  { %v1527_v6 = vadd.f32 %v1526_v3, %v1456_v2 }
 0x67b   :  { %v2396_v4 = vpop.f32.mrf.mxu0  ;;  %v2431_v5 = vpop.f32.mrf.mxu1 }
 0x699   :  { %v1612_v55 = vpop.f32.mrf.mxu0 }
 0x69a   :  { %v1616_v54 = vadd.f32 %v1612_v55, %v1527_v6 }
 0x69b   :  { %v2466_v56 = vpop.f32.mrf.mxu0 }
 0x69c   :  { %v1624_v7 = vadd.f32 %v1686_v29, %v1616_v54 }
 0x69e   :  { %v1626_v8 = vsel %vm1625_vm13, %v1624_v7, -inf }
 0x69f   :  { %1627 = vmax.xlane.f32.xlu0 %v1626_v8 }
 0x728   :  { %v1628_v0 = vpop.xlane.xlu0 %1627 }
 0x729   :  { %v1629_v9 = vsub.f32 %v1624_v7, %v1628_v0 }
 0x72b   :  { %v1630_v10 = vmul.f32 1.442695, %v1629_v9 }
 0x72d   :  { %2499 = vpow2.f32 %v1630_v10 }
 0x73a   :  { %v2500_v11 = vpop.eup %2499 }
 0x73b   :  { %v1632_v12 = vsel %vm1625_vm13, %v2500_v11, 0.0 }
 0x73c   :  { %1633 = vadd.xlane.f32.xlu0 %v1632_v12 }
 0x7c5   :  { %v1634_v13 = vpop.xlane.xlu0 %1633 }
 0x7c6   :  { %2501 = vrcp.f32 %v1634_v13 }
 0x7d3   :  { %v2502_v14 = vpop.eup %2501 }
 0x7d4   :  { %v1636_v15 = vmul.f32 %v2502_v14, %v2500_v11 }
 0x7d6   :  { %1637 = vst.msk [vmem:[#allocation8] sm:$0x3] %vm1625_vm13, %v1636_v15 }
 0x7d7   :  { %2574 = shalt.err (!%p2571_p5)
}
 0x7d8   :  { %1647 = dma.vmem_to_hbm [thread:$0]  %s1645_s22, 32, %s3207_s13, [#allocation4]  }
 0x7d9   :  { %2587 = dma.done.wait [#allocation4], 32  }
 0x7da   :  { %2588 = vsyncadd [#allocation4], 4294967264 }
 0x7db   :  { %1651 = vsyncpa [#allocation3], 1 }
 0x7dc   :  { %1652 = vsyncpa [#allocation6], 1 }
 0x7dd   :  { %1653 = vsyncpa [#allocation4], 1 }

</bundles_post_ra>
